<compile_context>
chip_gen: v7x
topology: tpu7x:2x2x1
jax: 0.10.0
libtpu: 0.0.40
codegen_flags: <defaults>
</compile_context>

<pallas_src>
import functools

import jax
import jax.numpy as jnp
from jax.experimental import pallas as pl
from jax.experimental.pallas import tpu as pltpu


def _conv_lrelu_kernel(x_ref, w_ref, b_ref, o_ref, patch_ref, *,
                       TH, W, Cin, K, negative_slope):
    # x_ref:     (1, 1, TH+2P, W+2P, Cin)  bf16  one (batch, row-tile) block incl. halo
    # w_ref:     (K*K*Cin, Cout_pad)       bf16  im2col weight matrix
    # b_ref:     (1, Cout_pad)             f32   bias (zero-padded)
    # o_ref:     (1, TH, W, Cout_pad)            output block (lane-dense last dim)
    # patch_ref: (TH*W, K*K*Cin)           f32   im2col scratch in VMEM
    x_tile = x_ref[0, 0].astype(jnp.float32)   # single cast; later relayouts are f32

    # Build the im2col patch matrix in VMEM scratch (9 tap copies), then do ONE
    # wide MXU matmul instead of 9 tiny ones.
    for kh in range(K):
        for kw in range(K):
            tap = kh * K + kw
            patch_ref[:, tap * Cin:(tap + 1) * Cin] = (
                x_tile[kh:kh + TH, kw:kw + W, :].reshape(TH * W, Cin))

    y = jnp.dot(patch_ref[...].astype(jnp.bfloat16), w_ref[...],
                preferred_element_type=jnp.float32)          # (TH*W, Cout_pad), f32 acc
    y = y + b_ref[...]                                        # bias in f32
    y = jnp.where(y > 0, y, negative_slope * y)               # LeakyReLU(0.2) in f32
    o_ref[0] = y.reshape(TH, W, y.shape[-1]).astype(o_ref.dtype)


def _pick_row_tile(H, W, Cin, Cout_pad, K, budget_bytes=20 * 1024 * 1024):
    """Largest row tile TH (divisor of H, <=256) whose padded VMEM footprint fits."""
    P = K // 2

    def padded_bytes(shape, itemsize):
        s = list(shape)
        s[-1] = -(-s[-1] // 128) * 128                     # lane dim -> 128
        sub = 32 // itemsize                               # sublane tile (8 f32 / 16 bf16)
        s[-2] = -(-s[-2] // sub) * sub
        n = 1
        for d in s:
            n *= d
        return n * itemsize

    best = 1
    for th in range(1, min(H, 256) + 1):
        if H % th:
            continue
        need = (
            2 * padded_bytes((th + 2 * P, W + 2 * P, Cin), 2)   # double-buffered bf16 input tile
            + 2 * padded_bytes((th, W, Cout_pad), 4)            # double-buffered output tile
            + padded_bytes((th * W, K * K * Cin), 4)            # f32 im2col scratch
            + padded_bytes((th + 2 * P, W + 2 * P, Cin), 4)     # in-kernel f32 copy of the tile
        )
        if need <= budget_bytes:
            best = th
    return best


def conv_layer_forward(x_nchw, weight_oihw, bias, *, negative_slope=0.2):
    """Forward of ConvLayer(in_c, out_c, kernel=3, stride=1, padding=1,
    activation_fn=LeakyReLU(0.2), norm=None, upscale=None, dropout=0)."""
    N, Cin, H, W = x_nchw.shape
    Cout, Cin_w, K, Kw = weight_oihw.shape
    assert Cin_w == Cin and Kw == K
    P = K // 2                                   # 'same' conv (kernel=3, padding=1, stride=1)
    LANE = 128
    Cout_pad = -(-Cout // LANE) * LANE           # lane-dense output channels

    TH = _pick_row_tile(H, W, Cin, Cout_pad, K)
    nh = H // TH
    Wp = W + 2 * P
    THH = TH + 2 * P                             # input rows per tile incl. halo

    # Wrapper glue (fuses into one XLA pass over the activation):
    # NCHW -> NHWC, cast to bf16, zero-pad spatially, gather overlapping TH+2P row
    # windows so every grid step receives its halo through a plain Blocked BlockSpec.
    x_nhwc = jnp.transpose(x_nchw, (0, 2, 3, 1)).astype(jnp.bfloat16)
    x_pad = jnp.pad(x_nhwc, ((0, 0), (P, P), (P, P), (0, 0)))
    rows = jnp.arange(nh)[:, None] * TH + jnp.arange(THH)[None, :]
    x_tiles = x_pad[:, rows]                     # (N, nh, THH, Wp, Cin)

    # Weights -> im2col matrix (K*K*Cin, Cout_pad) in (kh, kw, cin) row order.
    w_mat = jnp.transpose(weight_oihw, (2, 3, 1, 0)).reshape(K * K * Cin, Cout)
    w_mat = jnp.pad(w_mat, ((0, 0), (0, Cout_pad - Cout))).astype(jnp.bfloat16)
    b_vec = jnp.pad(bias.astype(jnp.float32), (0, Cout_pad - Cout)).reshape(1, Cout_pad)

    kernel = functools.partial(_conv_lrelu_kernel, TH=TH, W=W, Cin=Cin, K=K,
                               negative_slope=negative_slope)

    out_nhwc = pl.pallas_call(
        kernel,
        out_shape=jax.ShapeDtypeStruct((N, H, W, Cout_pad), x_nchw.dtype),
        grid=(N, nh),
        in_specs=[
            pl.BlockSpec((1, 1, THH, Wp, Cin), lambda n, h: (n, h, 0, 0, 0)),
            pl.BlockSpec((K * K * Cin, Cout_pad), lambda n, h: (0, 0)),
            pl.BlockSpec((1, Cout_pad), lambda n, h: (0, 0)),
        ],
        out_specs=pl.BlockSpec((1, TH, W, Cout_pad), lambda n, h: (n, h, 0, 0)),
        scratch_shapes=[pltpu.VMEM((TH * W, K * K * Cin), jnp.float32)],
        compiler_params=pltpu.CompilerParams(
            dimension_semantics=("parallel", "parallel"),
            vmem_limit_bytes=48 * 1024 * 1024),
    )(x_tiles, w_mat, b_vec)

    # Drop the Cout padding and return NCHW to match the PyTorch module.
    return jnp.transpose(out_nhwc[..., :Cout], (0, 3, 1, 2))


def _reference(x_nchw, weight_oihw, bias, negative_slope=0.2):
    P = weight_oihw.shape[-1] // 2
    y = jax.lax.conv_general_dilated(
        x_nchw, weight_oihw, window_strides=(1, 1), padding=((P, P), (P, P)),
        dimension_numbers=("NCHW", "OIHW", "NCHW"))
    y = y + bias.reshape(1, -1, 1, 1)
    return jnp.where(y > 0, y, negative_slope * y)


if __name__ == "__main__":
    key = jax.random.PRNGKey(0)
    k_x, k_w, k_b = jax.random.split(key, 3)

    N, Cin, H, W = 2, 4, 16, 16
    Cout, K = 8, 3

    x = jax.random.normal(k_x, (N, Cin, H, W), dtype=jnp.float32)
    # Deterministic synthetic parameters (shapes match nn.Conv2d(4, 8, 3)).
    weight = jax.random.normal(k_w, (Cout, Cin, K, K), dtype=jnp.float32) * 0.1
    bias = jax.random.normal(k_b, (Cout,), dtype=jnp.float32) * 0.1

    out = jax.block_until_ready(conv_layer_forward(x, weight, bias))
    assert out.shape == (N, Cout, H, W)

    # Tight check against a reference run at the kernel's compute precision
    # (inputs rounded to bf16, f32 accumulation) — validates the conv logic.
    ref_bf16 = _reference(x.astype(jnp.bfloat16).astype(jnp.float32),
                          weight.astype(jnp.bfloat16).astype(jnp.float32), bias)
    assert jnp.allclose(out, ref_bf16, rtol=1e-3, atol=1e-3), "mismatch vs bf16 reference"

    # Loose sanity check against the full-f32 reference (bf16 input rounding only).
    ref_f32 = _reference(x, weight, bias)
    assert jnp.allclose(out, ref_f32, rtol=5e-2, atol=5e-2), "mismatch vs f32 reference"

    print("KERNEL_OK")
</pallas_src>

<mosaic_0001>
module attributes {stable_mosaic.version = 11 : i64} {
  func.func @_conv_lrelu_kernel(%arg0: i32, %arg1: i32, %arg2: memref<1x1x18x18x4xbf16, #tpu.memory_space<vmem>>, %arg3: memref<36x128xbf16, #tpu.memory_space<vmem>>, %arg4: memref<1x128xf32, #tpu.memory_space<vmem>>, %arg5: memref<1x16x16x128xf32, #tpu.memory_space<vmem>>, %arg6: memref<256x36xf32, #tpu.memory_space<vmem>>) attributes {dimension_semantics = [#tpu.dimension_semantics<parallel>, #tpu.dimension_semantics<parallel>], iteration_bounds = array<i64: 2, 1>, scalar_prefetch = 0 : i64, scratch_operands = 1 : i64, tpu.core_type = #tpu.core_type<tc>, window_params = [{transform_indices = @transform_0, window_bounds = array<i64: 1, 1, 18, 18, 4>}, {pipeline_mode = #tpu.pipeline_mode<synchronous>, transform_indices = @transform_1, window_bounds = array<i64: 36, 128>}, {pipeline_mode = #tpu.pipeline_mode<synchronous>, transform_indices = @transform_2, window_bounds = array<i64: 1, 128>}, {transform_indices = @transform_3, window_bounds = array<i64: 1, 16, 16, 128>}]} {
    %c0 = arith.constant 0 : index
    %c0_0 = arith.constant 0 : index
    %c0_1 = arith.constant 0 : index
    %c0_2 = arith.constant 0 : index
    %c0_3 = arith.constant 0 : index
    %0 = vector.load %arg2[%c0, %c0_0, %c0_1, %c0_2, %c0_3] : memref<1x1x18x18x4xbf16, #tpu.memory_space<vmem>>, vector<1x1x18x18x4xbf16>
    %1 = vector.shape_cast %0 : vector<1x1x18x18x4xbf16> to vector<18x18x4xbf16>
    %2 = arith.extf %1 : vector<18x18x4xbf16> to vector<18x18x4xf32>
    %3 = vector.extract_strided_slice %2 {offsets = [0, 0, 0], sizes = [16, 16, 4], strides = [1, 1, 1]} : vector<18x18x4xf32> to vector<16x16x4xf32>
    %4 = vector.shape_cast %3 : vector<16x16x4xf32> to vector<256x4xf32>
    %c0_4 = arith.constant 0 : index
    %c0_5 = arith.constant 0 : index
    %5 = vector.load %arg6[%c0_4, %c0_5] : memref<256x36xf32, #tpu.memory_space<vmem>>, vector<256x4xf32>
    tpu.vector_store %arg6[%c0_4, %c0_5], %4 {strides = array<i32>} : memref<256x36xf32, #tpu.memory_space<vmem>>, vector<256x4xf32>,
    %6 = vector.extract_strided_slice %2 {offsets = [0, 1, 0], sizes = [16, 16, 4], strides = [1, 1, 1]} : vector<18x18x4xf32> to vector<16x16x4xf32>
    %7 = vector.shape_cast %6 : vector<16x16x4xf32> to vector<256x4xf32>
    %c0_6 = arith.constant 0 : index
    %c4 = arith.constant 4 : index
    %8 = vector.load %arg6[%c0_6, %c4] : memref<256x36xf32, #tpu.memory_space<vmem>>, vector<256x4xf32>
    tpu.vector_store %arg6[%c0_6, %c4], %7 {strides = array<i32>} : memref<256x36xf32, #tpu.memory_space<vmem>>, vector<256x4xf32>,
    %9 = vector.extract_strided_slice %2 {offsets = [0, 2, 0], sizes = [16, 16, 4], strides = [1, 1, 1]} : vector<18x18x4xf32> to vector<16x16x4xf32>
    %10 = vector.shape_cast %9 : vector<16x16x4xf32> to vector<256x4xf32>
    %c0_7 = arith.constant 0 : index
    %c8 = arith.constant 8 : index
    %11 = vector.load %arg6[%c0_7, %c8] : memref<256x36xf32, #tpu.memory_space<vmem>>, vector<256x4xf32>
    tpu.vector_store %arg6[%c0_7, %c8], %10 {strides = array<i32>} : memref<256x36xf32, #tpu.memory_space<vmem>>, vector<256x4xf32>,
    %12 = vector.extract_strided_slice %2 {offsets = [1, 0, 0], sizes = [16, 16, 4], strides = [1, 1, 1]} : vector<18x18x4xf32> to vector<16x16x4xf32>
    %13 = vector.shape_cast %12 : vector<16x16x4xf32> to vector<256x4xf32>
    %c0_8 = arith.constant 0 : index
    %c12 = arith.constant 12 : index
    %14 = vector.load %arg6[%c0_8, %c12] : memref<256x36xf32, #tpu.memory_space<vmem>>, vector<256x4xf32>
    tpu.vector_store %arg6[%c0_8, %c12], %13 {strides = array<i32>} : memref<256x36xf32, #tpu.memory_space<vmem>>, vector<256x4xf32>,
    %15 = vector.extract_strided_slice %2 {offsets = [1, 1, 0], sizes = [16, 16, 4], strides = [1, 1, 1]} : vector<18x18x4xf32> to vector<16x16x4xf32>
    %16 = vector.shape_cast %15 : vector<16x16x4xf32> to vector<256x4xf32>
    %c0_9 = arith.constant 0 : index
    %c16 = arith.constant 16 : index
    %17 = vector.load %arg6[%c0_9, %c16] : memref<256x36xf32, #tpu.memory_space<vmem>>, vector<256x4xf32>
    tpu.vector_store %arg6[%c0_9, %c16], %16 {strides = array<i32>} : memref<256x36xf32, #tpu.memory_space<vmem>>, vector<256x4xf32>,
    %18 = vector.extract_strided_slice %2 {offsets = [1, 2, 0], sizes = [16, 16, 4], strides = [1, 1, 1]} : vector<18x18x4xf32> to vector<16x16x4xf32>
    %19 = vector.shape_cast %18 : vector<16x16x4xf32> to vector<256x4xf32>
    %c0_10 = arith.constant 0 : index
    %c20 = arith.constant 20 : index
    %20 = vector.load %arg6[%c0_10, %c20] : memref<256x36xf32, #tpu.memory_space<vmem>>, vector<256x4xf32>
    tpu.vector_store %arg6[%c0_10, %c20], %19 {strides = array<i32>} : memref<256x36xf32, #tpu.memory_space<vmem>>, vector<256x4xf32>,
    %21 = vector.extract_strided_slice %2 {offsets = [2, 0, 0], sizes = [16, 16, 4], strides = [1, 1, 1]} : vector<18x18x4xf32> to vector<16x16x4xf32>
    %22 = vector.shape_cast %21 : vector<16x16x4xf32> to vector<256x4xf32>
    %c0_11 = arith.constant 0 : index
    %c24 = arith.constant 24 : index
    %23 = vector.load %arg6[%c0_11, %c24] : memref<256x36xf32, #tpu.memory_space<vmem>>, vector<256x4xf32>
    tpu.vector_store %arg6[%c0_11, %c24], %22 {strides = array<i32>} : memref<256x36xf32, #tpu.memory_space<vmem>>, vector<256x4xf32>,
    %24 = vector.extract_strided_slice %2 {offsets = [2, 1, 0], sizes = [16, 16, 4], strides = [1, 1, 1]} : vector<18x18x4xf32> to vector<16x16x4xf32>
    %25 = vector.shape_cast %24 : vector<16x16x4xf32> to vector<256x4xf32>
    %c0_12 = arith.constant 0 : index
    %c28 = arith.constant 28 : index
    %26 = vector.load %arg6[%c0_12, %c28] : memref<256x36xf32, #tpu.memory_space<vmem>>, vector<256x4xf32>
    tpu.vector_store %arg6[%c0_12, %c28], %25 {strides = array<i32>} : memref<256x36xf32, #tpu.memory_space<vmem>>, vector<256x4xf32>,
    %27 = vector.extract_strided_slice %2 {offsets = [2, 2, 0], sizes = [16, 16, 4], strides = [1, 1, 1]} : vector<18x18x4xf32> to vector<16x16x4xf32>
    %28 = vector.shape_cast %27 : vector<16x16x4xf32> to vector<256x4xf32>
    %c0_13 = arith.constant 0 : index
    %c32 = arith.constant 32 : index
    %29 = vector.load %arg6[%c0_13, %c32] : memref<256x36xf32, #tpu.memory_space<vmem>>, vector<256x4xf32>
    tpu.vector_store %arg6[%c0_13, %c32], %28 {strides = array<i32>} : memref<256x36xf32, #tpu.memory_space<vmem>>, vector<256x4xf32>,
    %c0_14 = arith.constant 0 : index
    %c0_15 = arith.constant 0 : index
    %30 = vector.load %arg6[%c0_14, %c0_15] : memref<256x36xf32, #tpu.memory_space<vmem>>, vector<256x36xf32>
    %31 = arith.truncf %30 : vector<256x36xf32> to vector<256x36xbf16>
    %c0_16 = arith.constant 0 : index
    %c0_17 = arith.constant 0 : index
    %32 = vector.load %arg3[%c0_16, %c0_17] : memref<36x128xbf16, #tpu.memory_space<vmem>>, vector<36x128xbf16>
    %cst = arith.constant dense<0.000000e+00> : vector<256x128xf32>
    %33 = tpu.matmul %31, %32, %cst {dimension_numbers = #tpu.dot_dimension_numbers<[1], [0], [0], [1], [0, 0, 1, 1], [], []>} : vector<256x36xbf16>, vector<36x128xbf16>, vector<256x128xf32> -> vector<256x128xf32>
    %c0_18 = arith.constant 0 : index
    %c0_19 = arith.constant 0 : index
    %34 = vector.load %arg4[%c0_18, %c0_19] : memref<1x128xf32, #tpu.memory_space<vmem>>, vector<1x128xf32>
    %35 = vector.broadcast %34 : vector<1x128xf32> to vector<256x128xf32>
    %36 = arith.addf %33, %35 : vector<256x128xf32>
    %cst_20 = arith.constant 0.000000e+00 : f32
    %37 = vector.broadcast %cst_20 : f32 to vector<256x128xf32>
    %38 = arith.cmpf ogt, %36, %37 : vector<256x128xf32>
    %cst_21 = arith.constant 2.000000e-01 : f32
    %39 = vector.broadcast %cst_21 : f32 to vector<256x128xf32>
    %40 = arith.mulf %39, %36 : vector<256x128xf32>
    %41 = arith.select %38, %36, %40 : vector<256x128xi1>, vector<256x128xf32>
    %42 = vector.shape_cast %41 : vector<256x128xf32> to vector<16x16x128xf32>
    %c0_22 = arith.constant 0 : index
    %c0_23 = arith.constant 0 : index
    %c0_24 = arith.constant 0 : index
    %c0_25 = arith.constant 0 : index
    %43 = vector.load %arg5[%c0_22, %c0_23, %c0_24, %c0_25] : memref<1x16x16x128xf32, #tpu.memory_space<vmem>>, vector<1x16x16x128xf32>
    %44 = vector.shape_cast %43 : vector<1x16x16x128xf32> to vector<16x16x128xf32>
    %45 = vector.shape_cast %42 : vector<16x16x128xf32> to vector<1x16x16x128xf32>
    tpu.vector_store %arg5[%c0_22, %c0_23, %c0_24, %c0_25], %45 {strides = array<i32>} : memref<1x16x16x128xf32, #tpu.memory_space<vmem>>, vector<1x16x16x128xf32>,
    return
  }
  func.func @transform_0(%arg0: i32, %arg1: i32) -> (i32, i32, i32, i32, i32) {
    %c0_i32 = arith.constant 0 : i32
    %c0_i32_0 = arith.constant 0 : i32
    %c0_i32_1 = arith.constant 0 : i32
    %c0_i32_2 = arith.constant 0 : i32
    return %arg0, %arg1, %c0_i32, %c0_i32_0, %c0_i32_1 : i32, i32, i32, i32, i32
  }
  func.func @transform_1(%arg0: i32, %arg1: i32) -> (i32, i32) {
    %c0_i32 = arith.constant 0 : i32
    %c0_i32_0 = arith.constant 0 : i32
    %c0_i32_1 = arith.constant 0 : i32
    return %c0_i32, %c0_i32_0 : i32, i32
  }
  func.func @transform_2(%arg0: i32, %arg1: i32) -> (i32, i32) {
    %c0_i32 = arith.constant 0 : i32
    %c0_i32_0 = arith.constant 0 : i32
    %c0_i32_1 = arith.constant 0 : i32
    return %c0_i32, %c0_i32_0 : i32, i32
  }
  func.func @transform_3(%arg0: i32, %arg1: i32) -> (i32, i32, i32, i32) {
    %c0_i32 = arith.constant 0 : i32
    %c0_i32_0 = arith.constant 0 : i32
    %c0_i32_1 = arith.constant 0 : i32
    return %arg0, %arg1, %c0_i32, %c0_i32_0 : i32, i32, i32, i32
  }
}

</mosaic_0001>

<bundles_post_ra>
// kernel: tpu_custom_call.1
= control target key start
LH: loop header
LB: loop body
LE: loop exit
PB: predicated region body
PF: predicated region fallthrough
CT: control target
= control target key end

     0   :  { %8 = vsyncpa [#allocation4], 0  ;;  %s4355_s0 = inlined_call_operand.vmem [shape: bf16[2,1,18,18,4], index: 0, kind: input, shape index: {}]   ;;  %s4356_s1 = inlined_call_operand.vmem [shape: bf16[36,128], index: 1, kind: input, shape index: {}]   ;;  %s4357_s2 = inlined_call_operand.vmem [shape: f32[1,128], index: 2, kind: input, shape index: {}]   ;;  %s4358_s3 = inlined_call_operand.hbm [shape: f32[2,16,16,128], index: 3, kind: output, shape index: {}]  }
   0x1   :  { %10 = vsyncpa [#allocation4 + $0x1], 0  ;;  %s3084_s12 = smov 0   ;;  %s3086_s13 = smov 0  }
   0x2   :  { %s3088_s14 = smov 0   ;;  %s3090_s15 = smov 0  }
   0x3   :  { %s3092_s16 = smov 0   ;;  %s3094_s17 = smov 0  }
   0x4 LB: > { %s2124_s18 = sadd.s32 4294967295, %s3052_s17   ;;  %s2125_s19 = sadd.s32 4294967294, %s3052_s17   ;;  %s3052_s17 = sphi %s3094_s17, %s16_s17   ;;  %s3048_s16 = sphi %s3092_s16, %s4454_s16   ;;  %s3044_s15 = sphi %s3090_s15, %s4453_s15   ;;  %s3040_s14 = sphi %s3088_s14, %s4452_s14   ;;  %s3036_s13 = sphi %s3086_s13, %s4451_s13   ;;  %s3032_s12 = sphi %s3084_s12, %s4450_s12  }
   0x5   : > { %s28_s20 = sadd.s32 1, %s3048_s16  ;;  %s107_s21 = sadd.s32 1, %s3040_s14 }
   0x6   : > { %p30_p0 = scmp.ge.s32.totalorder %s28_s20, 2  ;;  %p117_p1 = scmp.ne.s32.totalorder %s3040_s14, %s3036_s13 }
   0x7   : > { %p118_p2 = scmp.eq.s32.totalorder %s2124_s18, 1  ;;  %p123_p3 = scmp.ne.s32.totalorder %s3036_s13, %s3032_s12 }
   0x8   : > { %s4456_s20 = smov (%p30_p0, %s28_s20), 0  ;;  %p124_p5 = scmp.eq.s32.totalorder %s2125_s19, 1 }
   0x9   : > { %p3124_p4 = por %p118_p2, %p117_p1  ;;  %s102_s23 = ssub.s32 %s3048_s16, %s4456_s20 }
   0xa   : > { %p2128_p6 = scmp.ge.s32.totalorder %s3052_s17, 1  ;;  %p105_p7 = scmp.eq.s32.totalorder %s102_s23, 0 }
   0xb   : > { %p3131_p8 = por %p124_p5, %p123_p3  ;;  %p160_p9 = scmp.lt.s32.totalorder %s3052_s17, 3 }
   0xc   : > { %s3137_s25 = scalar_select %p105_p7, %s3040_s14, %s107_s21  }
   0xd   : > { %p161_p10 = pnand %p2128_p6, %p160_p9 }
   0xf   : > { %164 = sbr.rel (%p161_p10) target bundleno = 658 (0x292), region = 32 }
  0x16   : > { %p188_p11 = scmp.lt.s32.totalorder %s3044_s15, 1  ;;  %vm388_vm0 = vcmask 1046528   ;;  %vm307_vm1 = vcmask 31744   ;;  %s3054_s4 = smov 4   ;;  %vm598_vm2 = vcmask 1045504   ;;  %vm565_vm3 = vcmask 64544  }
  0x17   : > { %s3055_s5 = smov 8   ;;  %s3056_s6 = smov 12   ;;  %vm1732_vm4 = vcmask 1041408   ;;  %vm775_vm5 = vcmask 97344   ;;  %vm906_vm6 = vcmask 130144   ;;  %vm1041_vm7 = vcmask 162944  }
  0x18   : > { %s189_s26 = scalar_select %p188_p11, %s3044_s15, 1  ;;  %vm1175_vm8 = vcmask 195744   ;;  %vm1306_vm9 = vcmask 228544   ;;  %vm1441_vm10 = vcmask 261344   ;;  %vm1575_vm11 = vcmask 294144  }
  0x19   : > { %s3057_s7 = smov 16   ;;  %s3058_s8 = smov 20   ;;  %vm1683_vm12 = vcmask 293888  }
  0x1a   : > { %s2266_s27 = smul.u32 216, %s189_s26  ;;  %s3059_s9 = smov 24  }
  0x1b   : > { %s3060_s18 = smov 28   ;;  %s185_s28 = sand.u32 1, %s3036_s13  }
  0x1c   : > { %s3144_s30 = scalar_lea.vmem %s4355_s0, %s2266_s27  ;;  %s3061_s27 = smov 32  }
  0x1d   : > { %v2193_v0 = vld [vmem:[%s3144_s30 + $0x18] sm:$0xff]   ;;  %v3148_v1 = vld [vmem:[%s3144_s30 + $0x20] sm:$0x1]  ;;  %v3159_v7 = vld [vmem:[%s3144_s30 + $0x8] sm:$0x1]  ;;  %s4308_s11 = scalar_lea.sflag [#allocation4], %s185_s28 }
  0x1e   : > { %v2158_v2 = vld [vmem:[%s3144_s30] sm:$0xff]   ;;  %v3151_v3 = vunpack.c.l.bf16 %v2193_v0  ;;  %v3153_v4 = vunpack.c.h.bf16 %v2193_v0  ;;  %v4366_v5 = vunpack.c.l.bf16 %v3148_v1  ;;  %v3163_v9 = vld [vmem:[%s3144_s30 + $0x2c] sm:$0x1]  ;;  %v4368_v11 = vunpack.c.l.bf16 %v3159_v7  ;;  %v3190_v23 = vld [vmem:[%s3144_s30 + $0x14] sm:$0x1]  ;;  %s3062_s19 = smov [#allocation3]  }
  0x1f   : > { %v3156_v6 = vunpack.c.l.bf16 %v2158_v2  ;;  %v208_v8 = vld [vmem:[%s3144_s30 + $0x24] sm:$0xff]   ;;  %v3165_v10 = vunpack.c.h.bf16 %v2158_v2  ;;  %v202_v14 = vld [vmem:[%s3144_s30 + $0xc] sm:$0xff]   ;;  %v4367_v21 = vunpack.c.l.bf16 %v3163_v9  ;;  %v214_v28 = vld [vmem:[%s3144_s30 + $0x3c] sm:$0xff]   ;;  %v4369_v37 = vunpack.c.l.bf16 %v3190_v23  ;;  %s2978_s21 = sshll.u32 %s3062_s19, 4  ;;  %s2979_s21 = int_to_ptr.vmem [resolvable:$false] %s2978_s21 }
  0x20   : > { %v3168_v12 = vunpack.c.l.bf16 %v208_v8  ;;  %v3170_v13 = vunpack.c.h.bf16 %v208_v8  ;;  %v399_v15 = vrot.slane %v3151_v3, 1  ;;  %v400_v16 = vrot.slane %v3153_v4, 1  ;;  %313 = vst.msk [vmem:[#allocation2 + $0x28] sm:$0xff] %vm307_vm1, %v3153_v4  ;;  %312 = vst.msk [vmem:[#allocation2 + $0x20] sm:$0xff] %vm307_vm1, %v3151_v3  ;;  %v3211_v33 = vld [vmem:[%s3144_s30 + $0x44] sm:$0x1] }
  0x21   : > { %v402_v17 = vrot.slane %v4366_v5, 1  ;;  %v389_v18 = vrot.slane %v3156_v6, 1  ;;  %308 = vst.msk [vmem:[#allocation2] sm:$0xff] %vm307_vm1, %v3156_v6  ;;  %v390_v19 = vrot.slane %v3165_v10, 1  ;;  %v392_v20 = vrot.slane %v4368_v11, 1  ;;  %309 = vst.msk [vmem:[#allocation2 + $0x8] sm:$0xff] %vm307_vm1, %v3165_v10 }
  0x22   : > { %v404_v22 = vrot.slane %v3168_v12, 1  ;;  %314 = vst.msk [vmem:[#allocation2 + $0x30] sm:$0xff] %vm307_vm1, %v3168_v12  ;;  %315 = vst.msk [vmem:[#allocation2 + $0x38] sm:$0xff] %vm307_vm1, %v3170_v13  ;;  %v401_v24 = vsel %vm388_vm0, %v399_v15, %v400_v16  ;;  %v405_v26 = vrot.slane %v3170_v13, 1  ;;  %v3201_v27 = vunpack.c.l.bf16 %v202_v14  ;;  %v2194_v38 = vld [vmem:[%s3144_s30 + $0x30] sm:$0xff]   ;;  %v2195_v58 = vld [vmem:[%s3144_s30 + $0x48] sm:$0xff]  }
  0x23   : > { %v403_v25 = vsel %vm388_vm0, %v400_v16, %v402_v17  ;;  %v391_v30 = vsel %vm388_vm0, %v389_v18, %v390_v19  ;;  %v393_v31 = vsel %vm388_vm0, %v390_v19, %v392_v20  ;;  %v407_v32 = vrot.slane %v4367_v21, 1  ;;  %v3229_v43 = vld [vmem:[%s3144_s30 + $0x38] sm:$0x1]  ;;  %v3257_v57 = vld [vmem:[%s3144_s30 + $0x5c] sm:$0x1]  ;;  %v226_v19 = vld [vmem:[%s3144_s30 + $0x6c] sm:$0xff]  }
  0x24   : > { %4403 = vst [vmem:[#allocation6_spill] sm:$0xff] %v3201_v27  ;;  %v3204_v29 = vpack.i.bf16 %v403_v25, %v401_v24  ;;  %v2331_v34 = vpack.i.bf16 %v393_v31, %v391_v30  ;;  %v406_v35 = vsel %vm388_vm0, %v404_v22, %v405_v26  ;;  %v3214_v36 = vunpack.c.h.bf16 %v202_v14  ;;  %310 = vst.msk [vmem:[#allocation2 + $0x10] sm:$0xff] %vm307_vm1, %v3201_v27  ;;  %v220_v52 = vld [vmem:[%s3144_s30 + $0x54] sm:$0xff]   ;;  %v3279_v14 = vld [vmem:[%s3144_s30 + $0x50] sm:$0x1]  ;;  %s2980_s23 = scalar_lea.vmem %s2979_s21, 8192 }
  0x25   : > { %v408_v39 = vsel %vm388_vm0, %v405_v26, %v407_v32  ;;  %v394_v40 = vrot.slane %v3201_v27, 1  ;;  %v3224_v41 = vunpack.c.l.bf16 %v214_v28  ;;  %v3226_v42 = vunpack.c.h.bf16 %v214_v28  ;;  %v3296_v26 = vld [vmem:[%s3144_s30 + $0x74] sm:$0x1]  ;;  %v2196_v28 = vld [vmem:[%s3144_s30 + $0x60] sm:$0xff]  }
  0x26   : > { %4404 = vst [vmem:[#allocation7_spill] sm:$0xff] %v3204_v29  ;;  %4405 = vst [vmem:[#allocation8_spill] sm:$0xff] %v3214_v36  ;;  %2342 = vrot.lane.b32.xlu1 %v3204_v29, %s3054_s4  ;;  %2332 = vrot.lane.b32.xlu0 %v2331_v34, %s3054_s4  ;;  %v3232_v44 = vpack.i.bf16 %v408_v39, %v406_v35  ;;  %v395_v45 = vrot.slane %v3214_v36, 1  ;;  %v397_v46 = vrot.slane %v4369_v37, 1  ;;  %v4364_v47 = vunpack.c.l.bf16 %v3211_v33  ;;  %v244_v5 = vld [vmem:[%s3144_s30 + $0xb4] sm:$0xff]  }
  0x27   : > { %311 = vst.msk [vmem:[#allocation2 + $0x18] sm:$0xff] %vm307_vm1, %v3214_v36  ;;  %v414_v48 = vrot.slane %v3224_v41, 1  ;;  %v415_v49 = vrot.slane %v3226_v42, 1  ;;  %v3242_v50 = vunpack.c.l.bf16 %v2194_v38  ;;  %v3244_v51 = vunpack.c.h.bf16 %v2194_v38  ;;  %318 = vst.msk [vmem:[#allocation2 + $0x50] sm:$0xff] %vm307_vm1, %v3224_v41 }
  0x28   : > { %4406 = vst [vmem:[#allocation9_spill] sm:$0xff] %v3232_v44  ;;  %319 = vst.msk [vmem:[#allocation2 + $0x58] sm:$0xff] %vm307_vm1, %v3226_v42  ;;  %v396_v53 = vsel %vm388_vm0, %v394_v40, %v395_v45  ;;  %v398_v54 = vsel %vm388_vm0, %v395_v45, %v397_v46  ;;  %v417_v55 = vrot.slane %v4364_v47, 1  ;;  %v4363_v56 = vunpack.c.l.bf16 %v3229_v43  ;;  %v3320_v45 = vld [vmem:[%s3144_s30 + $0x68] sm:$0x1] }
  0x29   : > { %v3262_v59 = vpack.i.bf16 %v398_v54, %v396_v53  ;;  %v416_v60 = vsel %vm388_vm0, %v414_v48, %v415_v49  ;;  %v409_v61 = vrot.slane %v3242_v50, 1  ;;  %v410_v62 = vrot.slane %v3244_v51, 1  ;;  %316 = vst.msk [vmem:[#allocation2 + $0x40] sm:$0xff] %vm307_vm1, %v3242_v50  ;;  %317 = vst.msk [vmem:[#allocation2 + $0x48] sm:$0xff] %vm307_vm1, %v3244_v51  ;;  %v232_v53 = vld [vmem:[%s3144_s30 + $0x84] sm:$0xff]  }
  0x2a   : > { %2347 = vrot.lane.b32.xlu1 %v3232_v44, %s3054_s4  ;;  %v418_v63 = vsel %vm388_vm0, %v415_v49, %v417_v55  ;;  %v412_v0 = vrot.slane %v4363_v56, 1  ;;  %v3274_v2 = vunpack.c.l.bf16 %v220_v52  ;;  %v3276_v8 = vunpack.c.h.bf16 %v220_v52  ;;  %v3461_v44 = vld [vmem:[%s3144_s30 + $0xb0] sm:$0x1] }
  0x2b   : > { %4407 = vst [vmem:[#allocation10_spill] sm:$0xff] %v3262_v59  ;;  %2337 = vrot.lane.b32.xlu0 %v3262_v59, %s3054_s4  ;;  %v3283_v15 = vpack.i.bf16 %v418_v63, %v416_v60  ;;  %v411_v16 = vsel %vm388_vm0, %v409_v61, %v410_v62  ;;  %v4362_v17 = vunpack.c.l.bf16 %v3257_v57  ;;  %v3287_v18 = vunpack.c.l.bf16 %v2195_v58 }
  0x2c   : > { %v413_v20 = vsel %vm388_vm0, %v410_v62, %v412_v0  ;;  %v424_v22 = vrot.slane %v3274_v2, 1  ;;  %v425_v24 = vrot.slane %v3276_v8, 1  ;;  %v3293_v25 = vunpack.c.h.bf16 %v2195_v58  ;;  %322 = vst.msk [vmem:[#allocation2 + $0x70] sm:$0xff] %vm307_vm1, %v3274_v2  ;;  %323 = vst.msk [vmem:[#allocation2 + $0x78] sm:$0xff] %vm307_vm1, %v3276_v8 }
  0x2d   : > { %4408 = vst [vmem:[#allocation11_spill] sm:$0xff] %v3283_v15  ;;  %v3305_v30 = vpack.i.bf16 %v413_v20, %v411_v16  ;;  %v427_v31 = vrot.slane %v4362_v17, 1  ;;  %v4361_v32 = vunpack.c.l.bf16 %v3279_v14  ;;  %v419_v34 = vrot.slane %v3287_v18, 1  ;;  %320 = vst.msk [vmem:[#allocation2 + $0x60] sm:$0xff] %vm307_vm1, %v3287_v18  ;;  %v3349_v16 = vld [vmem:[%s3144_s30 + $0x8c] sm:$0x1] }
  0x2e   : > { %2357 = vrot.lane.b32.xlu1 %v3283_v15, %s3054_s4  ;;  %v426_v35 = vsel %vm388_vm0, %v424_v22, %v425_v24  ;;  %v420_v38 = vrot.slane %v3293_v25, 1  ;;  %v3315_v39 = vunpack.c.l.bf16 %v226_v19  ;;  %v3317_v40 = vunpack.c.h.bf16 %v226_v19  ;;  %321 = vst.msk [vmem:[#allocation2 + $0x68] sm:$0xff] %vm307_vm1, %v3293_v25  ;;  %v2197_v19 = vld [vmem:[%s3144_s30 + $0x78] sm:$0xff]  }
  0x2f   : > { %4409 = vst [vmem:[#allocation12_spill] sm:$0xff] %v3305_v30  ;;  %2352 = vrot.lane.b32.xlu0 %v3305_v30, %s3054_s4  ;;  %v428_v46 = vsel %vm388_vm0, %v425_v24, %v427_v31  ;;  %v422_v48 = vrot.slane %v4361_v32, 1  ;;  %v4360_v49 = vunpack.c.l.bf16 %v3296_v26  ;;  %v3330_v52 = vunpack.c.l.bf16 %v2196_v28 }
  0x30   : > { %v3333_v54 = vpack.i.bf16 %v428_v46, %v426_v35  ;;  %v421_v55 = vsel %vm388_vm0, %v419_v34, %v420_v38  ;;  %v434_v58 = vrot.slane %v3315_v39, 1  ;;  %v435_v60 = vrot.slane %v3317_v40, 1  ;;  %326 = vst.msk [vmem:[#allocation2 + $0x90] sm:$0xff] %vm307_vm1, %v3315_v39  ;;  %327 = vst.msk [vmem:[#allocation2 + $0x98] sm:$0xff] %vm307_vm1, %v3317_v40  ;;  %v3369_v46 = vld [vmem:[%s3144_s30 + $0x80] sm:$0x1] }
  0x31   : > { %v423_v61 = vsel %vm388_vm0, %v420_v38, %v422_v48  ;;  %v437_v62 = vrot.slane %v4360_v49, 1  ;;  %v3345_v63 = vunpack.c.h.bf16 %v2196_v28  ;;  %v4359_v0 = vunpack.c.l.bf16 %v3320_v45  ;;  %324 = vst.msk [vmem:[#allocation2 + $0x80] sm:$0xff] %vm307_vm1, %v3330_v52 }
  0x32   : > { %4410 = vst [vmem:[#allocation13_spill] sm:$0xff] %v3333_v54  ;;  %2367 = vrot.lane.b32.xlu1 %v3333_v54, %s3054_s4  ;;  %v3356_v20 = vpack.i.bf16 %v423_v61, %v421_v55  ;;  %v436_v22 = vsel %vm388_vm0, %v434_v58, %v435_v60  ;;  %v429_v24 = vrot.slane %v3330_v52, 1  ;;  %v3360_v28 = vunpack.c.l.bf16 %v232_v53  ;;  %v238_v61 = vld [vmem:[%s3144_s30 + $0x9c] sm:$0xff]  }
  0x33   : > { %v438_v31 = vsel %vm388_vm0, %v435_v60, %v437_v62  ;;  %v430_v34 = vrot.slane %v3345_v63, 1  ;;  %v432_v35 = vrot.slane %v4359_v0, 1  ;;  %v3366_v38 = vunpack.c.h.bf16 %v232_v53  ;;  %325 = vst.msk [vmem:[#allocation2 + $0x88] sm:$0xff] %vm307_vm1, %v3345_v63 }
  0x34   : > { %4411 = vst [vmem:[#allocation14_spill] sm:$0xff] %v3356_v20  ;;  %2362 = vrot.lane.b32.xlu0 %v3356_v20, %s3054_s4  ;;  %v3375_v48 = vpack.i.bf16 %v438_v31, %v436_v22  ;;  %v4365_v55 = vunpack.c.l.bf16 %v3349_v16  ;;  %v444_v58 = vrot.slane %v3360_v28, 1  ;;  %v3379_v60 = vunpack.c.l.bf16 %v2197_v19  ;;  %330 = vst.msk [vmem:[#allocation2 + $0xb0] sm:$0xff] %vm307_vm1, %v3360_v28  ;;  %v3390_v22 = vld [vmem:[%s3144_s30 + $0xa4] sm:$0x1]  ;;  %v2198_v31 = vld [vmem:[%s3144_s30 + $0x90] sm:$0xff]  }
  0x35   : > { %v431_v53 = vsel %vm388_vm0, %v429_v24, %v430_v34  ;;  %v433_v62 = vsel %vm388_vm0, %v430_v34, %v432_v35  ;;  %v445_v0 = vrot.slane %v3366_v38, 1  ;;  %v3387_v49 = vunpack.c.h.bf16 %v2197_v19  ;;  %331 = vst.msk [vmem:[#allocation2 + $0xb8] sm:$0xff] %vm307_vm1, %v3366_v38 }
  0x36   : > { %4412 = vst [vmem:[#allocation15_spill] sm:$0xff] %v3375_v48  ;;  %2377 = vrot.lane.b32.xlu1 %v3375_v48, %s3054_s4  ;;  %v3397_v32 = vpack.i.bf16 %v433_v62, %v431_v53  ;;  %v447_v24 = vrot.slane %v4365_v55, 1  ;;  %v4372_v34 = vunpack.c.l.bf16 %v3369_v46  ;;  %v439_v19 = vrot.slane %v3379_v60, 1  ;;  %328 = vst.msk [vmem:[#allocation2 + $0xa0] sm:$0xff] %vm307_vm1, %v3379_v60  ;;  %v3412_v53 = vld [vmem:[%s3144_s30 + $0x98] sm:$0x1] }
  0x37   : > { %v446_v35 = vsel %vm388_vm0, %v444_v58, %v445_v0  ;;  %v440_v17 = vrot.slane %v3387_v49, 1  ;;  %v3407_v56 = vunpack.c.l.bf16 %v238_v61  ;;  %v3409_v47 = vunpack.c.h.bf16 %v238_v61  ;;  %329 = vst.msk [vmem:[#allocation2 + $0xa8] sm:$0xff] %vm307_vm1, %v3387_v49 }
  0x38   : > { %4413 = vst [vmem:[#allocation16_spill] sm:$0xff] %v3397_v32  ;;  %2372 = vrot.lane.b32.xlu0 %v3397_v32, %s3054_s4  ;;  %v448_v62 = vsel %vm388_vm0, %v445_v0, %v447_v24  ;;  %v442_v58 = vrot.slane %v4372_v34, 1  ;;  %v4375_v55 = vunpack.c.l.bf16 %v3390_v22  ;;  %v3422_v61 = vunpack.c.l.bf16 %v2198_v31  ;;  %v2199_v34 = vld [vmem:[%s3144_s30 + $0xa8] sm:$0xff]  }
  0x39   : > { %v3425_v21 = vpack.i.bf16 %v448_v62, %v446_v35  ;;  %v441_v11 = vsel %vm388_vm0, %v439_v19, %v440_v17  ;;  %v454_v37 = vrot.slane %v3407_v56, 1  ;;  %v455_v32 = vrot.slane %v3409_v47, 1  ;;  %334 = vst.msk [vmem:[#allocation2 + $0xd0] sm:$0xff] %vm307_vm1, %v3407_v56  ;;  %335 = vst.msk [vmem:[#allocation2 + $0xd8] sm:$0xff] %vm307_vm1, %v3409_v47  ;;  %v3441_v62 = vld [vmem:[%s3144_s30 + $0xbc] sm:$0x1] }
  0x3a   : > { %v443_v0 = vsel %vm388_vm0, %v440_v17, %v442_v58  ;;  %v457_v24 = vrot.slane %v4375_v55, 1  ;;  %v3437_v35 = vunpack.c.h.bf16 %v2198_v31  ;;  %332 = vst.msk [vmem:[#allocation2 + $0xc0] sm:$0xff] %vm307_vm1, %v3422_v61  ;;  %v449_v58 = vrot.slane %v3422_v61, 1 }
  0x3b   : > { %4414 = vst [vmem:[#allocation17_spill] sm:$0xff] %v3425_v21  ;;  %2387 = vrot.lane.b32.xlu1 %v3425_v21, %s3054_s4  ;;  %v3448_v54 = vpack.i.bf16 %v443_v0, %v441_v11  ;;  %v456_v17 = vsel %vm388_vm0, %v454_v37, %v455_v32  ;;  %v3452_v55 = vunpack.c.l.bf16 %v244_v5  ;;  %v4416_v20 = vunpack.c.l.bf16 %v3412_v53 }
  0x3c   : > { %v458_v31 = vsel %vm388_vm0, %v455_v32, %v457_v24  ;;  %v450_v19 = vrot.slane %v3437_v35, 1  ;;  %v3458_v30 = vunpack.c.h.bf16 %v244_v5  ;;  %333 = vst.msk [vmem:[#allocation2 + $0xc8] sm:$0xff] %vm307_vm1, %v3437_v35  ;;  %v4390_v37 = vunpack.c.l.bf16 %v3441_v62 }
  0x3d   : > { %4415 = vst [vmem:[#allocation18_spill] sm:$0xff] %v3448_v54  ;;  %v452_v15 = vrot.slane %v4416_v20, 1  ;;  %2382 = vrot.lane.b32.xlu0 %v3448_v54, %s3054_s4  ;;  %v3467_v11 = vpack.i.bf16 %v458_v31, %v456_v17  ;;  %v464_v32 = vrot.slane %v3452_v55, 1  ;;  %v3471_v0 = vunpack.c.l.bf16 %v2199_v34  ;;  %338 = vst.msk [vmem:[#allocation2 + $0xf0] sm:$0xff] %vm307_vm1, %v3452_v55 }
  0x3e   : > { %v451_v5 = vsel %vm388_vm0, %v449_v58, %v450_v19  ;;  %v465_v24 = vrot.slane %v3458_v30, 1  ;;  %v3478_v21 = vunpack.c.h.bf16 %v2199_v34  ;;  %339 = vst.msk [vmem:[#allocation2 + $0xf8] sm:$0xff] %vm307_vm1, %v3458_v30  ;;  %v467_v31 = vrot.slane %v4390_v37, 1 }
  0x3f   : > { %4417 = vst [vmem:[#allocation19_spill] sm:$0xff] %v3467_v11  ;;  %v453_v20 = vsel %vm388_vm0, %v450_v19, %v452_v15  ;;  %2397 = vrot.lane.b32.xlu1 %v3467_v11, %s3054_s4  ;;  %v4400_v29 = vunpack.c.l.bf16 %v3461_v44  ;;  %v459_v58 = vrot.slane %v3471_v0, 1  ;;  %336 = vst.msk [vmem:[#allocation2 + $0xe0] sm:$0xff] %vm307_vm1, %v3471_v0  ;;  %v604_v19 = vrot.slane %v3201_v27, 2 }
  0x40   : > { %v3484_v17 = vpack.i.bf16 %v453_v20, %v451_v5  ;;  %v466_v15 = vsel %vm388_vm0, %v464_v32, %v465_v24  ;;  %v460_v34 = vrot.slane %v3478_v21, 1  ;;  %v605_v11 = vrot.slane %v3214_v36, 2  ;;  %337 = vst.msk [vmem:[#allocation2 + $0xe8] sm:$0xff] %vm307_vm1, %v3478_v21 }
  0x41   : > { %v468_v5 = vsel %vm388_vm0, %v465_v24, %v467_v31  ;;  %v462_v20 = vrot.slane %v4400_v29, 1  ;;  %v4419_v37 = vunpack.c.l.bf16 %v3190_v23  ;;  %v599_v54 = vrot.slane %v3156_v6, 2 }
  0x42   : > { %4418 = vst [vmem:[#allocation20_spill] sm:$0xff] %v3484_v17  ;;  %2392 = vrot.lane.b32.xlu0 %v3484_v17, %s3054_s4  ;;  %v3506_v59 = vpack.i.bf16 %v468_v5, %v466_v15  ;;  %v461_v48 = vsel %vm388_vm0, %v459_v58, %v460_v34  ;;  %v606_v36 = vsel %vm598_vm2, %v604_v19, %v605_v11  ;;  %v600_v27 = vrot.slane %v3165_v10, 2 }
  0x43   : > { %v607_v32 = vrot.slane %v4419_v37, 2  ;;  %v463_v17 = vsel %vm388_vm0, %v460_v34, %v462_v20  ;;  %v4420_v31 = vunpack.c.l.bf16 %v3159_v7  ;;  %v614_v23 = vrot.slane %v3168_v12, 2 }
  0x44   : > { %2407 = vrot.lane.b32.xlu1 %v3506_v59, %s3054_s4  ;;  %v3518_v6 = vpack.i.bf16 %v463_v17, %v461_v48  ;;  %v601_v58 = vsel %vm598_vm2, %v599_v54, %v600_v27  ;;  %v615_v10 = vrot.slane %v3170_v13, 2  ;;  %v609_v7 = vrot.slane %v3151_v3, 2 }
  0x45   : > { %v608_v24 = vsel %vm598_vm2, %v605_v11, %v607_v32  ;;  %v602_v29 = vrot.slane %v4420_v31, 2  ;;  %v4421_v11 = vunpack.c.l.bf16 %v3163_v9  ;;  %v610_v19 = vrot.slane %v3153_v4, 2 }
  0x46   : > { %v3520_v37 = vpack.i.bf16 %v608_v24, %v606_v36  ;;  %2402 = vrot.lane.b32.xlu0 %v3518_v6, %s3054_s4  ;;  %v616_v36 = vsel %vm598_vm2, %v614_v23, %v615_v10  ;;  %v4422_v17 = vunpack.c.l.bf16 %v3148_v1  ;;  %v624_v5 = vrot.slane %v3224_v41, 2  ;;  %s2129_s4 = sshll.u32 %s185_s28, 8 }
  0x47   : > { %v603_v15 = vsel %vm598_vm2, %v600_v27, %v602_v29  ;;  %v617_v34 = vrot.slane %v4421_v11, 2  ;;  %v611_v9 = vsel %vm598_vm2, %v609_v7, %v610_v19  ;;  %v625_v29 = vrot.slane %v3226_v42, 2 }
  0x48   : > { %v2411_v48 = vpack.i.bf16 %v603_v15, %v601_v58  ;;  %v612_v54 = vrot.slane %v4422_v17, 2  ;;  %v4423_v20 = vunpack.c.l.bf16 %v3211_v33  ;;  %2417 = vrot.lane.b32.xlu1 %v3520_v37, %s3055_s5  ;;  %v619_v31 = vrot.slane %v3242_v50, 2 }
  0x49   : > { %v618_v27 = vsel %vm598_vm2, %v615_v10, %v617_v34  ;;  %v620_v23 = vrot.slane %v3244_v51, 2  ;;  %v626_v58 = vsel %vm598_vm2, %v624_v5, %v625_v29  ;;  %v4424_v15 = vunpack.c.l.bf16 %v3229_v43 }
  0x4a   : > { %v627_v32 = vrot.slane %v4423_v20, 2  ;;  %v3542_v24 = vpack.i.bf16 %v618_v27, %v616_v36  ;;  %v613_v1 = vsel %vm598_vm2, %v610_v19, %v612_v54  ;;  %2412 = vrot.lane.b32.xlu0 %v2411_v48, %s3055_s5  ;;  %v634_v7 = vrot.slane %v3274_v2, 2 }
  0x4b   : > { %v622_v33 = vrot.slane %v4424_v15, 2  ;;  %v3552_v11 = vpack.i.bf16 %v613_v1, %v611_v9  ;;  %v621_v34 = vsel %vm598_vm2, %v619_v31, %v620_v23  ;;  %v635_v19 = vrot.slane %v3276_v8, 2 }
  0x4c   : > { %v628_v10 = vsel %vm598_vm2, %v625_v29, %v627_v32  ;;  %v4425_v17 = vunpack.c.l.bf16 %v3257_v57  ;;  %v629_v5 = vrot.slane %v3287_v18, 2  ;;  %v630_v43 = vrot.slane %v3293_v25, 2  ;;  %2427 = vrot.lane.b32.xlu1 %v3542_v24, %s3055_s5 }
  0x4d   : > { %v623_v36 = vsel %vm598_vm2, %v620_v23, %v622_v33  ;;  %v3564_v48 = vpack.i.bf16 %v628_v10, %v626_v58  ;;  %v636_v27 = vsel %vm598_vm2, %v634_v7, %v635_v19  ;;  %v4426_v9 = vunpack.c.l.bf16 %v3279_v14 }
  0x4e   : > { %v637_v54 = vrot.slane %v4425_v17, 2  ;;  %v644_v20 = vrot.slane %v3315_v39, 2  ;;  %v631_v57 = vsel %vm598_vm2, %v629_v5, %v630_v43  ;;  %v645_v1 = vrot.slane %v3317_v40, 2  ;;  %2422 = vrot.lane.b32.xlu0 %v3552_v11, %s3055_s5 }
  0x4f   : > { %v632_v29 = vrot.slane %v4426_v9, 2  ;;  %v4427_v31 = vunpack.c.l.bf16 %v3296_v26  ;;  %v3577_v58 = vpack.i.bf16 %v623_v36, %v621_v34  ;;  %v639_v14 = vrot.slane %v3330_v52, 2 }
  0x50   : > { %v638_v32 = vsel %vm598_vm2, %v635_v19, %v637_v54  ;;  %v640_v15 = vrot.slane %v3345_v63, 2  ;;  %v4428_v7 = vunpack.c.l.bf16 %v3320_v45  ;;  %2437 = vrot.lane.b32.xlu1 %v3564_v48, %s3055_s5  ;;  %v646_v17 = vsel %vm598_vm2, %v644_v20, %v645_v1 }
  0x51   : > { %v647_v23 = vrot.slane %v4427_v31, 2  ;;  %v633_v10 = vsel %vm598_vm2, %v630_v43, %v632_v29  ;;  %v3582_v33 = vpack.i.bf16 %v638_v32, %v636_v27  ;;  %v654_v34 = vrot.slane %v3360_v28, 2 }
  0x52   : > { %v642_v19 = vrot.slane %v4428_v7, 2  ;;  %v3588_v26 = vpack.i.bf16 %v633_v10, %v631_v57  ;;  %v655_v36 = vrot.slane %v3366_v38, 2  ;;  %v4429_v5 = vunpack.c.l.bf16 %v3349_v16  ;;  %2432 = vrot.lane.b32.xlu0 %v3577_v58, %s3055_s5 }
  0x53   : > { %v648_v54 = vsel %vm598_vm2, %v645_v1, %v647_v23  ;;  %v649_v27 = vrot.slane %v3379_v60, 2  ;;  %v650_v45 = vrot.slane %v3387_v49, 2  ;;  %v641_v9 = vsel %vm598_vm2, %v639_v14, %v640_v15 }
  0x54   : > { %v657_v43 = vrot.slane %v4429_v5, 2  ;;  %v643_v29 = vsel %vm598_vm2, %v640_v15, %v642_v19  ;;  %v656_v20 = vsel %vm598_vm2, %v654_v34, %v655_v36  ;;  %v4430_v32 = vunpack.c.l.bf16 %v3369_v46  ;;  %2447 = vrot.lane.b32.xlu1 %v3582_v33, %s3055_s5 }
  0x55   : > { %v664_v16 = vrot.slane %v3407_v56, 2  ;;  %v665_v31 = vrot.slane %v3409_v47, 2  ;;  %v4431_v23 = vunpack.c.l.bf16 %v3390_v22  ;;  %v3612_v14 = vpack.i.bf16 %v648_v54, %v646_v17 }
  0x56   : > { %v652_v57 = vrot.slane %v4430_v32, 2  ;;  %v658_v1 = vsel %vm598_vm2, %v655_v36, %v657_v43  ;;  %v3614_v15 = vpack.i.bf16 %v643_v29, %v641_v9  ;;  %v651_v7 = vsel %vm598_vm2, %v649_v27, %v650_v45  ;;  %2442 = vrot.lane.b32.xlu0 %v3588_v26, %s3055_s5 }
  0x57   : > { %v667_v10 = vrot.slane %v4431_v23, 2  ;;  %v3619_v46 = vpack.i.bf16 %v658_v1, %v656_v20  ;;  %v659_v34 = vrot.slane %v3422_v61, 2  ;;  %v660_v22 = vrot.slane %v3437_v35, 2  ;;  %v4435_v1 = vld [vmem:[#allocation6_spill] sm:$0xff] }
  0x58   : > { %v653_v19 = vsel %vm598_vm2, %v650_v45, %v652_v57  ;;  %v666_v36 = vsel %vm598_vm2, %v664_v16, %v665_v31  ;;  %v4432_v54 = vunpack.c.l.bf16 %v3412_v53  ;;  %v674_v43 = vrot.slane %v3452_v55, 2  ;;  %2457 = vrot.lane.b32.xlu1 %v3612_v14, %s3055_s5  ;;  %v4436_v16 = vld [vmem:[#allocation8_spill] sm:$0xff] }
  0x59   : > { %v668_v17 = vsel %vm598_vm2, %v665_v31, %v667_v10  ;;  %v675_v27 = vrot.slane %v3458_v30, 2  ;;  %v4433_v45 = vunpack.c.l.bf16 %v3441_v62  ;;  %v669_v29 = vrot.slane %v3471_v0, 2 }
  0x5a   : > { %v662_v5 = vrot.slane %v4432_v54, 2  ;;  %v3637_v20 = vpack.i.bf16 %v3153_v4, %v3151_v3  ;;  %v670_v32 = vrot.slane %v3478_v21, 2  ;;  %v4434_v53 = vunpack.c.l.bf16 %v3461_v44  ;;  %2452 = vrot.lane.b32.xlu0 %v3614_v15, %s3055_s5 }
  0x5b   : > { %v677_v9 = vrot.slane %v4433_v45, 2  ;;  %v2491_v31 = vpack.i.bf16 %v4436_v16, %v4435_v1  ;;  %v3646_v23 = vpack.i.bf16 %v3244_v51, %v3242_v50  ;;  %v3650_v62 = vpack.i.bf16 %v653_v19, %v651_v7 }
  0x5c   : > { %v672_v57 = vrot.slane %v4434_v53, 2  ;;  %v3652_v10 = vpack.i.bf16 %v668_v17, %v666_v36  ;;  %v3656_v3 = vpack.i.bf16 %v3170_v13, %v3168_v12  ;;  %v3660_v4 = vpack.i.bf16 %v3293_v25, %v3287_v18  ;;  %2467 = vrot.lane.b32.xlu1 %v3619_v46, %s3055_s5  ;;  %v4437_v36 = vld [vmem:[#allocation15_spill] sm:$0xff] }
  0x5d   : > { %v661_v44 = vsel %vm598_vm2, %v659_v34, %v660_v22  ;;  %v663_v50 = vsel %vm598_vm2, %v660_v22, %v662_v5  ;;  %v3666_v51 = vpack.i.bf16 %v3226_v42, %v3224_v41  ;;  %v3670_v7 = vpack.i.bf16 %v3276_v8, %v3274_v2 }
  0x5e   : > { %v676_v12 = vsel %vm598_vm2, %v674_v43, %v675_v27  ;;  %v678_v13 = vsel %vm598_vm2, %v675_v27, %v677_v9  ;;  %v3678_v18 = vpack.i.bf16 %v3387_v49, %v3379_v60  ;;  %v3682_v25 = vpack.i.bf16 %v3366_v38, %v3360_v28  ;;  %2462 = vrot.lane.b32.xlu0 %v3650_v62, %s3055_s5  ;;  %v2200_v38 = vld [vmem:[%s3144_s30 + $0xc0] sm:$0xff]   ;;  %v4438_v43 = vld [vmem:[#allocation10_spill] sm:$0xff] }
  0x5f   : > { %v671_v41 = vsel %vm598_vm2, %v669_v29, %v670_v32  ;;  %v673_v42 = vsel %vm598_vm2, %v670_v32, %v672_v57  ;;  %v3688_v2 = vpack.i.bf16 %v3409_v47, %v3407_v56  ;;  %v3692_v8 = vpack.i.bf16 %v663_v50, %v661_v44  ;;  %v4439_v9 = vld [vmem:[#allocation18_spill] sm:$0xff]  ;;  %v4440_v32 = vld [vmem:[#allocation7_spill] sm:$0xff] }
  0x60   : > { %v3696_v49 = vpack.i.bf16 %v3458_v30, %v3452_v55  ;;  %v3698_v60 = vpack.i.bf16 %v678_v13, %v676_v12  ;;  %2477 = vrot.lane.b32.xlu1 %v3652_v10, %s3055_s5  ;;  %v3702_v28 = vpack.i.bf16 %v673_v42, %v671_v41  ;;  %v3710_v47 = vpack.i.bf16 %v3437_v35, %v3422_v61  ;;  %v249_v55 = vld [vmem:[%s3144_s30 + $0xc8] sm:$0x1]  ;;  %v2971_v42 = vld [vmem:[%s4356_s1] sm:$0xff]  }
  0x61   : > { %v3719_v56 = vpack.i.bf16 %v3478_v21, %v3471_v0  ;;  %v3729_v30 = vpack.i.bf16 %v3345_v63, %v3330_v52  ;;  %v3739_v21 = vpack.i.bf16 %v3317_v40, %v3315_v39  ;;  %v2191_v52 = vunpack.c.l.bf16 %v2200_v38  ;;  %2220 = vmatprep.subr.bf16.mxu0 %v2971_v42  ;;  %2258 = vmatprep.subr.bf16.mxu1 %v2971_v42 }
  0x62   : > { %2472 = vrot.lane.b32.xlu0 %v3692_v8, %s3055_s5  ;;  %v2192_v63 = vunpack.c.h.bf16 %v2200_v38  ;;  %v303_v61 = vunpack.c.l.bf16 %v249_v55  ;;  %2221 = vmatpush3.bf16.msra.mxu0 %v2971_v42  ;;  %v2972_v55 = vld [vmem:[%s4356_s1 + $0x8] sm:$0xff]  }
  0x63   : > { %v940_v40 = vrot.slane %v2191_v52, 1  ;;  %v1074_v17 = vrot.slane %v2191_v52, 2  ;;  %2261 = vmatpush3.bf16.msra.mxu1 %v2971_v42  ;;  %2222 = vmatprep.subr.bf16.mxu0 %v2972_v55  ;;  %v4444_v42 = vld [vmem:[#allocation12_spill] sm:$0xff] }
  0x64   : > { %2487 = vrot.lane.b32.xlu1 %v3698_v60, %s3055_s5  ;;  %v3753_v39 = vpack.i.bf16 %v2192_v63, %v2191_v52  ;;  %v941_v35 = vrot.slane %v2192_v63, 1  ;;  %v943_v0 = vrot.slane %v303_v61, 1  ;;  %v1075_v54 = vrot.slane %v2192_v63, 2  ;;  %2259 = vmatprep.subr.bf16.mxu1 %v2972_v55 }
  0x65   : > { %v1077_v5 = vrot.slane %v303_v61, 2  ;;  %v4441_v61 = vld [vmem:[#allocation17_spill] sm:$0xff] }
  0x66   : > { %2482 = vrot.lane.b32.xlu0 %v3702_v28, %s3055_s5  ;;  %v942_v19 = vsel %vm388_vm0, %v940_v40, %v941_v35  ;;  %v944_v34 = vsel %vm388_vm0, %v941_v35, %v943_v0  ;;  %v1076_v27 = vsel %vm598_vm2, %v1074_v17, %v1075_v54  ;;  %2223 = vmatpush3.bf16.msra.mxu0 %v2972_v55 }
  0x67   : > { %v3761_v22 = vpack.i.bf16 %v944_v34, %v942_v19  ;;  %v1078_v45 = vsel %vm598_vm2, %v1075_v54, %v1077_v5  ;;  %v4442_v19 = vld [vmem:[#allocation9_spill] sm:$0xff]  ;;  %2262 = vmatpush3.bf16.msra.mxu1 %v2972_v55  ;;  %v2973_v5 = vld [vmem:[%s4356_s1 + $0x10] ss:$0 sps:$4 sm:$0x33]  }
  0x68   : > { %2497 = vrot.lane.b32.xlu1 %v3637_v20, %s3056_s6  ;;  %v3773_v29 = vpack.i.bf16 %v1078_v45, %v1076_v27  ;;  %2264 = vmatprep.subr.msk.bf16.mxu0 %vm1732_vm4, %v2973_v5 }
  0x69   : > { %2265 = vmatprep.subr.msk.bf16.mxu1 %vm1732_vm4, %v2973_v5 }
  0x6a   : > { %2492 = vrot.lane.b32.xlu0 %v2491_v31, %s3056_s6 }
  0x6c   : > { %2507 = vrot.lane.b32.xlu1 %v3646_v23, %s3056_s6 }
  0x6e   : > { %2502 = vrot.lane.b32.xlu0 %v3656_v3, %s3056_s6 }
  0x70   : > { %2517 = vrot.lane.b32.xlu1 %v3660_v4, %s3056_s6 }
  0x72   : > { %2512 = vrot.lane.b32.xlu0 %v3666_v51, %s3056_s6 }
  0x74   : > { %2527 = vrot.lane.b32.xlu1 %v3729_v30, %s3056_s6 }
  0x76   : > { %2522 = vrot.lane.b32.xlu0 %v3670_v7, %s3056_s6 }
  0x78   : > { %2537 = vrot.lane.b32.xlu1 %v3678_v18, %s3056_s6 }
  0x7a   : > { %2532 = vrot.lane.b32.xlu0 %v3739_v21, %s3056_s6 }
  0x7c   : > { %2547 = vrot.lane.b32.xlu1 %v3710_v47, %s3056_s6 }
  0x7e   : > { %2542 = vrot.lane.b32.xlu0 %v3682_v25, %s3056_s6 }
  0x80   : > { %2557 = vrot.lane.b32.xlu1 %v3719_v56, %s3056_s6 }
  0x82   : > { %2552 = vrot.lane.b32.xlu0 %v3688_v2, %s3056_s6 }
  0x84   : > { %2567 = vrot.lane.b32.xlu1 %v3753_v39, %s3056_s6 }
  0x86   : > { %2562 = vrot.lane.b32.xlu0 %v3696_v49, %s3056_s6  ;;  %s4238_s6 = scalar_lea.vmem [#allocation3], %s2129_s4 }
  0x88   : > { %2577 = vrot.lane.b32.xlu1 %v4437_v36, %s3057_s7 }
  0x8a   : > { %2572 = vrot.lane.b32.xlu0 %v4438_v43, %s3057_s7 }
  0x8c   : > { %2587 = vrot.lane.b32.xlu1 %v4439_v9, %s3057_s7 }
  0x8e   : > { %2582 = vrot.lane.b32.xlu0 %v4440_v32, %s3057_s7 }
  0x90   : > { %2597 = vrot.lane.b32.xlu1 %v3612_v14, %s3058_s8 }
  0x92   : > { %2592 = vrot.lane.b32.xlu0 %v3520_v37, %s3058_s8 }
  0x94   : > { %2607 = vrot.lane.b32.xlu1 %v3650_v62, %s3058_s8 }
  0x96   : > { %2602 = vrot.lane.b32.xlu0 %v3552_v11, %s3058_s8 }
  0x98   : > { %v2343_v53 = vpop.permute.xlu1 %2342  ;;  %2617 = vrot.lane.b32.xlu1 %v3678_v18, %s3059_s9  ;;  %v2333_v16 = vpop.permute.xlu0 %2332 }
  0x99   : > { %v2345_v57 = vunpack.i.h.bf16 %v2343_v53  ;;  %v2344_v1 = vunpack.i.l.bf16 %v2343_v53  ;;  %v2335_v31 = vunpack.i.h.bf16 %v2333_v16  ;;  %v2334_v44 = vunpack.i.l.bf16 %v2333_v16 }
  0x9a   : > { %2612 = vrot.lane.b32.xlu0 %v3637_v20, %s3059_s9 }
  0x9b   : > { %571 = vst.msk [vmem:[#allocation2 + $0x28] sm:$0xff] %vm565_vm3, %v2345_v57  ;;  %570 = vst.msk [vmem:[#allocation2 + $0x20] sm:$0xff] %vm565_vm3, %v2344_v1 }
  0x9c   : > { %567 = vst.msk [vmem:[#allocation2 + $0x8] sm:$0xff] %vm565_vm3, %v2335_v31  ;;  %566 = vst.msk [vmem:[#allocation2] sm:$0xff] %vm565_vm3, %v2334_v44  ;;  %v2348_v37 = vpop.permute.xlu1 %2347  ;;  %2627 = vrot.lane.b32.xlu1 %v3682_v25, %s3059_s9 }
  0x9d   : > { %v2350_v50 = vunpack.i.h.bf16 %v2348_v37  ;;  %v2349_v12 = vunpack.i.l.bf16 %v2348_v37  ;;  %v2338_v13 = vpop.permute.xlu0 %2337 }
  0x9e   : > { %2622 = vrot.lane.b32.xlu0 %v3656_v3, %s3059_s9  ;;  %v2340_v20 = vunpack.i.h.bf16 %v2338_v13  ;;  %v2339_v18 = vunpack.i.l.bf16 %v2338_v13 }
  0x9f   : > { %573 = vst.msk [vmem:[#allocation2 + $0x38] sm:$0xff] %vm565_vm3, %v2350_v50  ;;  %572 = vst.msk [vmem:[#allocation2 + $0x30] sm:$0xff] %vm565_vm3, %v2349_v12 }
  0xa0   : > { %v2358_v41 = vpop.permute.xlu1 %2357  ;;  %569 = vst.msk [vmem:[#allocation2 + $0x18] sm:$0xff] %vm565_vm3, %v2340_v20  ;;  %568 = vst.msk [vmem:[#allocation2 + $0x10] sm:$0xff] %vm565_vm3, %v2339_v18  ;;  %2637 = vrot.lane.b32.xlu1 %v4439_v9, %s3060_s18  ;;  %v1734_v9 = vsel %vm1732_vm4, %v2973_v5, 0 }
  0xa1   : > { %v2360_v3 = vunpack.i.h.bf16 %v2358_v41  ;;  %v2359_v25 = vunpack.i.l.bf16 %v2358_v41  ;;  %v2353_v38 = vpop.permute.xlu0 %2352  ;;  %2225 = vmatpush3.bf16.msra.mxu0 %v1734_v9  ;;  %2263 = vmatpush3.bf16.msra.mxu1 %v1734_v9  ;;  %v4443_v41 = vld [vmem:[#allocation20_spill] sm:$0xff] }
  0xa2   : > { %2632 = vrot.lane.b32.xlu0 %v4440_v32, %s3060_s18  ;;  %v2355_v52 = vunpack.i.h.bf16 %v2353_v38  ;;  %v2354_v63 = vunpack.i.l.bf16 %v2353_v38 }
  0xa3   : > { %577 = vst.msk [vmem:[#allocation2 + $0x58] sm:$0xff] %vm565_vm3, %v2360_v3  ;;  %576 = vst.msk [vmem:[#allocation2 + $0x50] sm:$0xff] %vm565_vm3, %v2359_v25 }
  0xa4   : > { %575 = vst.msk [vmem:[#allocation2 + $0x48] sm:$0xff] %vm565_vm3, %v2355_v52  ;;  %574 = vst.msk [vmem:[#allocation2 + $0x40] sm:$0xff] %vm565_vm3, %v2354_v63  ;;  %2647 = vrot.lane.b32.xlu1 %v4441_v61, %s3060_s18  ;;  %v2368_v40 = vpop.permute.xlu1 %2367 }
  0xa5   : > { %v2370_v35 = vunpack.i.h.bf16 %v2368_v40  ;;  %v2369_v0 = vunpack.i.l.bf16 %v2368_v40 }
  0xa6   : > { %2642 = vrot.lane.b32.xlu0 %v4442_v19, %s3060_s18  ;;  %v2363_v34 = vpop.permute.xlu0 %2362 }
  0xa7   : > { %581 = vst.msk [vmem:[#allocation2 + $0x78] sm:$0xff] %vm565_vm3, %v2370_v35  ;;  %580 = vst.msk [vmem:[#allocation2 + $0x70] sm:$0xff] %vm565_vm3, %v2369_v0  ;;  %v2365_v17 = vunpack.i.h.bf16 %v2363_v34  ;;  %v2364_v54 = vunpack.i.l.bf16 %v2363_v34 }
  0xa8   : > { %2657 = vrot.lane.b32.xlu1 %v3650_v62, %s3061_s27  ;;  %v2378_v43 = vpop.permute.xlu1 %2377 }
  0xa9   : > { %579 = vst.msk [vmem:[#allocation2 + $0x68] sm:$0xff] %vm565_vm3, %v2365_v17  ;;  %578 = vst.msk [vmem:[#allocation2 + $0x60] sm:$0xff] %vm565_vm3, %v2364_v54  ;;  %v2380_v27 = vunpack.i.h.bf16 %v2378_v43  ;;  %v2379_v45 = vunpack.i.l.bf16 %v2378_v43 }
  0xaa   : > { %2652 = vrot.lane.b32.xlu0 %v3552_v11, %s3061_s27  ;;  %v2373_v32 = vpop.permute.xlu0 %2372 }
  0xab   : > { %585 = vst.msk [vmem:[#allocation2 + $0x98] sm:$0xff] %vm565_vm3, %v2380_v27  ;;  %584 = vst.msk [vmem:[#allocation2 + $0x90] sm:$0xff] %vm565_vm3, %v2379_v45  ;;  %v2375_v62 = vunpack.i.h.bf16 %v2373_v32  ;;  %v2374_v53 = vunpack.i.l.bf16 %v2373_v32 }
  0xac   : > { %2667 = vrot.lane.b32.xlu1 %v3619_v46, %s3061_s27 }
  0xad   : > { %583 = vst.msk [vmem:[#allocation2 + $0x88] sm:$0xff] %vm565_vm3, %v2375_v62  ;;  %582 = vst.msk [vmem:[#allocation2 + $0x80] sm:$0xff] %vm565_vm3, %v2374_v53  ;;  %v2388_v57 = vpop.permute.xlu1 %2387 }
  0xae   : > { %2662 = vrot.lane.b32.xlu0 %v3542_v24, %s3061_s27  ;;  %v2390_v11 = vunpack.i.h.bf16 %v2388_v57  ;;  %v2389_v1 = vunpack.i.l.bf16 %v2388_v57 }
  0xaf   : > { %v2383_v16 = vpop.permute.xlu0 %2382 }
  0xb0   : > { %589 = vst.msk [vmem:[#allocation2 + $0xb8] sm:$0xff] %vm565_vm3, %v2390_v11  ;;  %588 = vst.msk [vmem:[#allocation2 + $0xb0] sm:$0xff] %vm565_vm3, %v2389_v1  ;;  %v2385_v31 = vunpack.i.h.bf16 %v2383_v16  ;;  %v2384_v44 = vunpack.i.l.bf16 %v2383_v16  ;;  %2677 = vrot.lane.b32.xlu1 %v4441_v61, %s3057_s7 }
  0xb1   : > { %v2398_v37 = vpop.permute.xlu1 %2397 }
  0xb2   : > { %587 = vst.msk [vmem:[#allocation2 + $0xa8] sm:$0xff] %vm565_vm3, %v2385_v31  ;;  %586 = vst.msk [vmem:[#allocation2 + $0xa0] sm:$0xff] %vm565_vm3, %v2384_v44  ;;  %2672 = vrot.lane.b32.xlu0 %v4442_v19, %s3057_s7  ;;  %v2400_v50 = vunpack.i.h.bf16 %v2398_v37  ;;  %v2399_v12 = vunpack.i.l.bf16 %v2398_v37  ;;  %v4445_v37 = vld [vmem:[#allocation19_spill] sm:$0xff] }
  0xb4   : > { %v2393_v13 = vpop.permute.xlu0 %2392  ;;  %593 = vst.msk [vmem:[#allocation2 + $0xd8] sm:$0xff] %vm565_vm3, %v2400_v50  ;;  %592 = vst.msk [vmem:[#allocation2 + $0xd0] sm:$0xff] %vm565_vm3, %v2399_v12  ;;  %2687 = vrot.lane.b32.xlu1 %v4443_v41, %s3057_s7 }
  0xb5   : > { %v2395_v20 = vunpack.i.h.bf16 %v2393_v13  ;;  %v2394_v18 = vunpack.i.l.bf16 %v2393_v13  ;;  %v4446_v13 = vld [vmem:[#allocation11_spill] sm:$0xff] }
  0xb6   : > { %2682 = vrot.lane.b32.xlu0 %v4444_v42, %s3057_s7  ;;  %v2408_v3 = vpop.permute.xlu1 %2407 }
  0xb7   : > { %591 = vst.msk [vmem:[#allocation2 + $0xc8] sm:$0xff] %vm565_vm3, %v2395_v20  ;;  %590 = vst.msk [vmem:[#allocation2 + $0xc0] sm:$0xff] %vm565_vm3, %v2394_v18  ;;  %v2410_v25 = vunpack.i.h.bf16 %v2408_v3  ;;  %v2409_v38 = vunpack.i.l.bf16 %v2408_v3 }
  0xb8   : > { %v2403_v52 = vpop.permute.xlu0 %2402  ;;  %2697 = vrot.lane.b32.xlu1 %v3619_v46, %s3058_s8 }
  0xb9   : > { %597 = vst.msk [vmem:[#allocation2 + $0xf8] sm:$0xff] %vm565_vm3, %v2410_v25  ;;  %596 = vst.msk [vmem:[#allocation2 + $0xf0] sm:$0xff] %vm565_vm3, %v2409_v38  ;;  %v2405_v63 = vunpack.i.h.bf16 %v2403_v52  ;;  %v2404_v55 = vunpack.i.l.bf16 %v2403_v52 }
  0xba   : > { %2692 = vrot.lane.b32.xlu0 %v3542_v24, %s3058_s8  ;;  %v2418_v61 = vpop.permute.xlu1 %2417 }
  0xbb   : > { %595 = vst.msk [vmem:[#allocation2 + $0xe8] sm:$0xff] %vm565_vm3, %v2405_v63  ;;  %594 = vst.msk [vmem:[#allocation2 + $0xe0] sm:$0xff] %vm565_vm3, %v2404_v55  ;;  %v2420_v40 = vunpack.i.h.bf16 %v2418_v61  ;;  %v2419_v35 = vunpack.i.l.bf16 %v2418_v61 }
  0xbc   : > { %v2413_v0 = vpop.permute.xlu0 %2412  ;;  %2707 = vrot.lane.b32.xlu1 %v3692_v8, %s3058_s8 }
  0xbd   : > { %778 = vst.msk [vmem:[#allocation2 + $0x10] sm:$0xff] %vm775_vm5, %v2419_v35  ;;  %779 = vst.msk [vmem:[#allocation2 + $0x18] sm:$0xff] %vm775_vm5, %v2420_v40  ;;  %v2415_v46 = vunpack.i.h.bf16 %v2413_v0  ;;  %v2414_v19 = vunpack.i.l.bf16 %v2413_v0 }
  0xbe   : > { %2702 = vrot.lane.b32.xlu0 %v3577_v58, %s3058_s8  ;;  %v2428_v24 = vpop.permute.xlu1 %2427 }
  0xbf   : > { %776 = vst.msk [vmem:[#allocation2] sm:$0xff] %vm775_vm5, %v2414_v19  ;;  %777 = vst.msk [vmem:[#allocation2 + $0x8] sm:$0xff] %vm775_vm5, %v2415_v46  ;;  %v2430_v34 = vunpack.i.h.bf16 %v2428_v24  ;;  %v2429_v17 = vunpack.i.l.bf16 %v2428_v24 }
  0xc0   : > { %v2423_v54 = vpop.permute.xlu0 %2422  ;;  %2717 = vrot.lane.b32.xlu1 %v3710_v47, %s3059_s9 }
  0xc1   : > { %783 = vst.msk [vmem:[#allocation2 + $0x38] sm:$0xff] %vm775_vm5, %v2430_v34  ;;  %782 = vst.msk [vmem:[#allocation2 + $0x30] sm:$0xff] %vm775_vm5, %v2429_v17  ;;  %v2425_v5 = vunpack.i.h.bf16 %v2423_v54  ;;  %v2424_v43 = vunpack.i.l.bf16 %v2423_v54 }
  0xc2   : > { %2712 = vrot.lane.b32.xlu0 %v3646_v23, %s3059_s9  ;;  %v2438_v27 = vpop.permute.xlu1 %2437 }
  0xc3   : > { %781 = vst.msk [vmem:[#allocation2 + $0x28] sm:$0xff] %vm775_vm5, %v2425_v5  ;;  %780 = vst.msk [vmem:[#allocation2 + $0x20] sm:$0xff] %vm775_vm5, %v2424_v43  ;;  %v2440_v45 = vunpack.i.h.bf16 %v2438_v27  ;;  %v2439_v9 = vunpack.i.l.bf16 %v2438_v27  ;;  %v4447_v27 = vld [vmem:[#allocation14_spill] sm:$0xff] }
  0xc4   : > { %v2433_v32 = vpop.permute.xlu0 %2432  ;;  %2727 = vrot.lane.b32.xlu1 %v3688_v2, %s3059_s9 }
  0xc5   : > { %787 = vst.msk [vmem:[#allocation2 + $0x58] sm:$0xff] %vm775_vm5, %v2440_v45  ;;  %786 = vst.msk [vmem:[#allocation2 + $0x50] sm:$0xff] %vm775_vm5, %v2439_v9  ;;  %v2435_v47 = vunpack.i.h.bf16 %v2433_v32  ;;  %v2434_v62 = vunpack.i.l.bf16 %v2433_v32 }
  0xc6   : > { %2722 = vrot.lane.b32.xlu0 %v3666_v51, %s3059_s9  ;;  %v2448_v23 = vpop.permute.xlu1 %2447 }
  0xc7   : > { %784 = vst.msk [vmem:[#allocation2 + $0x40] sm:$0xff] %vm775_vm5, %v2434_v62  ;;  %785 = vst.msk [vmem:[#allocation2 + $0x48] sm:$0xff] %vm775_vm5, %v2435_v47  ;;  %v2450_v53 = vunpack.i.h.bf16 %v2448_v23  ;;  %v2449_v57 = vunpack.i.l.bf16 %v2448_v23 }
  0xc8   : > { %v2443_v11 = vpop.permute.xlu0 %2442  ;;  %2737 = vrot.lane.b32.xlu1 %v4443_v41, %s3060_s18 }
  0xc9   : > { %791 = vst.msk [vmem:[#allocation2 + $0x78] sm:$0xff] %vm775_vm5, %v2450_v53  ;;  %790 = vst.msk [vmem:[#allocation2 + $0x70] sm:$0xff] %vm775_vm5, %v2449_v57  ;;  %v2445_v2 = vunpack.i.h.bf16 %v2443_v11  ;;  %v2444_v1 = vunpack.i.l.bf16 %v2443_v11 }
  0xca   : > { %2732 = vrot.lane.b32.xlu0 %v4444_v42, %s3060_s18  ;;  %v2458_v51 = vpop.permute.xlu1 %2457 }
  0xcb   : > { %788 = vst.msk [vmem:[#allocation2 + $0x60] sm:$0xff] %vm775_vm5, %v2444_v1  ;;  %789 = vst.msk [vmem:[#allocation2 + $0x68] sm:$0xff] %vm775_vm5, %v2445_v2  ;;  %v2460_v16 = vunpack.i.h.bf16 %v2458_v51  ;;  %v2459_v31 = vunpack.i.l.bf16 %v2458_v51 }
  0xcc   : > { %v2453_v44 = vpop.permute.xlu0 %2452  ;;  %2747 = vrot.lane.b32.xlu1 %v4445_v37, %s3060_s18 }
  0xcd   : > { %795 = vst.msk [vmem:[#allocation2 + $0x98] sm:$0xff] %vm775_vm5, %v2460_v16  ;;  %794 = vst.msk [vmem:[#allocation2 + $0x90] sm:$0xff] %vm775_vm5, %v2459_v31  ;;  %v2455_v50 = vunpack.i.h.bf16 %v2453_v44  ;;  %v2454_v12 = vunpack.i.l.bf16 %v2453_v44 }
  0xce   : > { %2742 = vrot.lane.b32.xlu0 %v4446_v13, %s3060_s18  ;;  %v2468_v20 = vpop.permute.xlu1 %2467 }
  0xcf   : > { %792 = vst.msk [vmem:[#allocation2 + $0x80] sm:$0xff] %vm775_vm5, %v2454_v12  ;;  %793 = vst.msk [vmem:[#allocation2 + $0x88] sm:$0xff] %vm775_vm5, %v2455_v50  ;;  %v2470_v18 = vunpack.i.h.bf16 %v2468_v20  ;;  %v2469_v41 = vunpack.i.l.bf16 %v2468_v20 }
  0xd0   : > { %v2463_v42 = vpop.permute.xlu0 %2462  ;;  %2757 = vrot.lane.b32.xlu1 %v3692_v8, %s3061_s27 }
  0xd1   : > { %799 = vst.msk [vmem:[#allocation2 + $0xb8] sm:$0xff] %vm775_vm5, %v2470_v18  ;;  %798 = vst.msk [vmem:[#allocation2 + $0xb0] sm:$0xff] %vm775_vm5, %v2469_v41  ;;  %v2465_v3 = vunpack.i.h.bf16 %v2463_v42  ;;  %v2464_v25 = vunpack.i.l.bf16 %v2463_v42 }
  0xd2   : > { %2752 = vrot.lane.b32.xlu0 %v3577_v58, %s3061_s27  ;;  %v2478_v38 = vpop.permute.xlu1 %2477 }
  0xd3   : > { %796 = vst.msk [vmem:[#allocation2 + $0xa0] sm:$0xff] %vm775_vm5, %v2464_v25  ;;  %797 = vst.msk [vmem:[#allocation2 + $0xa8] sm:$0xff] %vm775_vm5, %v2465_v3  ;;  %v2480_v52 = vunpack.i.h.bf16 %v2478_v38  ;;  %v2479_v63 = vunpack.i.l.bf16 %v2478_v38 }
  0xd4   : > { %v2473_v55 = vpop.permute.xlu0 %2472  ;;  %2767 = vrot.lane.b32.xlu1 %v3652_v10, %s3061_s27 }
  0xd5   : > { %803 = vst.msk [vmem:[#allocation2 + $0xd8] sm:$0xff] %vm775_vm5, %v2480_v52  ;;  %802 = vst.msk [vmem:[#allocation2 + $0xd0] sm:$0xff] %vm775_vm5, %v2479_v63  ;;  %v2475_v8 = vunpack.i.h.bf16 %v2473_v55  ;;  %v2474_v61 = vunpack.i.l.bf16 %v2473_v55 }
  0xd6   : > { %2762 = vrot.lane.b32.xlu0 %v3564_v48, %s3061_s27  ;;  %v2488_v58 = vpop.permute.xlu1 %2487 }
  0xd7   : > { %800 = vst.msk [vmem:[#allocation2 + $0xc0] sm:$0xff] %vm775_vm5, %v2474_v61  ;;  %801 = vst.msk [vmem:[#allocation2 + $0xc8] sm:$0xff] %vm775_vm5, %v2475_v8  ;;  %v2490_v40 = vunpack.i.h.bf16 %v2488_v58  ;;  %v2489_v35 = vunpack.i.l.bf16 %v2488_v58  ;;  %v4448_v8 = vld [vmem:[#allocation13_spill] sm:$0xff] }
  0xd8   : > { %v2483_v0 = vpop.permute.xlu0 %2482  ;;  %2777 = vrot.lane.b32.xlu1 %v4445_v37, %s3057_s7 }
  0xd9   : > { %807 = vst.msk [vmem:[#allocation2 + $0xf8] sm:$0xff] %vm775_vm5, %v2490_v40  ;;  %806 = vst.msk [vmem:[#allocation2 + $0xf0] sm:$0xff] %vm775_vm5, %v2489_v35  ;;  %v2485_v46 = vunpack.i.h.bf16 %v2483_v0  ;;  %v2484_v19 = vunpack.i.l.bf16 %v2483_v0 }
  0xda   : > { %2772 = vrot.lane.b32.xlu0 %v4446_v13, %s3057_s7  ;;  %v2498_v24 = vpop.permute.xlu1 %2497 }
  0xdb   : > { %804 = vst.msk [vmem:[#allocation2 + $0xe0] sm:$0xff] %vm775_vm5, %v2484_v19  ;;  %805 = vst.msk [vmem:[#allocation2 + $0xe8] sm:$0xff] %vm775_vm5, %v2485_v46  ;;  %v2500_v34 = vunpack.i.h.bf16 %v2498_v24  ;;  %v2499_v17 = vunpack.i.l.bf16 %v2498_v24 }
  0xdc   : > { %v2493_v54 = vpop.permute.xlu0 %2492  ;;  %2787 = vrot.lane.b32.xlu1 %v3518_v6, %s3057_s7 }
  0xdd   : > { %909 = vst.msk [vmem:[#allocation2 + $0x10] sm:$0xff] %vm906_vm6, %v2499_v17  ;;  %910 = vst.msk [vmem:[#allocation2 + $0x18] sm:$0xff] %vm906_vm6, %v2500_v34  ;;  %v2495_v5 = vunpack.i.h.bf16 %v2493_v54  ;;  %v2494_v43 = vunpack.i.l.bf16 %v2493_v54 }
  0xde   : > { %2782 = vrot.lane.b32.xlu0 %v4447_v27, %s3057_s7  ;;  %v2508_v45 = vpop.permute.xlu1 %2507 }
  0xdf   : > { %907 = vst.msk [vmem:[#allocation2] sm:$0xff] %vm906_vm6, %v2494_v43  ;;  %908 = vst.msk [vmem:[#allocation2 + $0x8] sm:$0xff] %vm906_vm6, %v2495_v5  ;;  %v2510_v9 = vunpack.i.h.bf16 %v2508_v45  ;;  %v2509_v32 = vunpack.i.l.bf16 %v2508_v45 }
  0xe0   : > { %v2503_v47 = vpop.permute.xlu0 %2502  ;;  %2797 = vrot.lane.b32.xlu1 %v3652_v10, %s3058_s8 }
  0xe1   : > { %913 = vst.msk [vmem:[#allocation2 + $0x30] sm:$0xff] %vm906_vm6, %v2509_v32  ;;  %914 = vst.msk [vmem:[#allocation2 + $0x38] sm:$0xff] %vm906_vm6, %v2510_v9  ;;  %v2505_v62 = vunpack.i.h.bf16 %v2503_v47  ;;  %v2504_v23 = vunpack.i.l.bf16 %v2503_v47 }
  0xe2   : > { %2792 = vrot.lane.b32.xlu0 %v3564_v48, %s3058_s8  ;;  %v2518_v53 = vpop.permute.xlu1 %2517 }
  0xe3   : > { %911 = vst.msk [vmem:[#allocation2 + $0x20] sm:$0xff] %vm906_vm6, %v2504_v23  ;;  %912 = vst.msk [vmem:[#allocation2 + $0x28] sm:$0xff] %vm906_vm6, %v2505_v62  ;;  %v2520_v57 = vunpack.i.h.bf16 %v2518_v53  ;;  %v2519_v11 = vunpack.i.l.bf16 %v2518_v53 }
  0xe4   : > { %v2513_v2 = vpop.permute.xlu0 %2512  ;;  %2807 = vrot.lane.b32.xlu1 %v3702_v28, %s3058_s8 }
  0xe5   : > { %917 = vst.msk [vmem:[#allocation2 + $0x50] sm:$0xff] %vm906_vm6, %v2519_v11  ;;  %918 = vst.msk [vmem:[#allocation2 + $0x58] sm:$0xff] %vm906_vm6, %v2520_v57  ;;  %v2515_v10 = vunpack.i.h.bf16 %v2513_v2  ;;  %v2514_v1 = vunpack.i.l.bf16 %v2513_v2  ;;  %v4449_v57 = vld [vmem:[#allocation16_spill] sm:$0xff] }
  0xe6   : > { %2802 = vrot.lane.b32.xlu0 %v3588_v26, %s3058_s8  ;;  %v2528_v48 = vpop.permute.xlu1 %2527 }
  0xe7   : > { %915 = vst.msk [vmem:[#allocation2 + $0x40] sm:$0xff] %vm906_vm6, %v2514_v1  ;;  %916 = vst.msk [vmem:[#allocation2 + $0x48] sm:$0xff] %vm906_vm6, %v2515_v10  ;;  %v2530_v51 = vunpack.i.h.bf16 %v2528_v48  ;;  %v2529_v16 = vunpack.i.l.bf16 %v2528_v48 }
  0xe8   : > { %v2523_v31 = vpop.permute.xlu0 %2522  ;;  %2817 = vrot.lane.b32.xlu1 %v3719_v56, %s3059_s9 }
  0xe9   : > { %921 = vst.msk [vmem:[#allocation2 + $0x70] sm:$0xff] %vm906_vm6, %v2529_v16  ;;  %922 = vst.msk [vmem:[#allocation2 + $0x78] sm:$0xff] %vm906_vm6, %v2530_v51  ;;  %v2525_v44 = vunpack.i.h.bf16 %v2523_v31  ;;  %v2524_v37 = vunpack.i.l.bf16 %v2523_v31  ;;  %v250_v16 = vld [vmem:[%s3144_s30 + $0xcc] sm:$0xff]  }
  0xea   : > { %2812 = vrot.lane.b32.xlu0 %v3660_v4, %s3059_s9  ;;  %v2538_v50 = vpop.permute.xlu1 %2537 }
  0xeb   : > { %919 = vst.msk [vmem:[#allocation2 + $0x60] sm:$0xff] %vm906_vm6, %v2524_v37  ;;  %920 = vst.msk [vmem:[#allocation2 + $0x68] sm:$0xff] %vm906_vm6, %v2525_v44  ;;  %v2540_v12 = vunpack.i.h.bf16 %v2538_v50  ;;  %v2539_v13 = vunpack.i.l.bf16 %v2538_v50  ;;  %v252_v44 = vld [vmem:[%s3144_s30 + $0xd4] sm:$0x1] }
  0xec   : > { %v2533_v20 = vpop.permute.xlu0 %2532  ;;  %2827 = vrot.lane.b32.xlu1 %v3696_v49, %s3059_s9 }
  0xed   : > { %925 = vst.msk [vmem:[#allocation2 + $0x90] sm:$0xff] %vm906_vm6, %v2539_v13  ;;  %926 = vst.msk [vmem:[#allocation2 + $0x98] sm:$0xff] %vm906_vm6, %v2540_v12  ;;  %v2535_v56 = vunpack.i.h.bf16 %v2533_v20  ;;  %v2534_v18 = vunpack.i.l.bf16 %v2533_v20  ;;  %v4026_v12 = vunpack.c.l.bf16 %v250_v16  ;;  %v4028_v13 = vunpack.c.h.bf16 %v250_v16 }
  0xee   : > { %2822 = vrot.lane.b32.xlu0 %v3670_v7, %s3059_s9  ;;  %v2548_v4 = vpop.permute.xlu1 %2547 }
  0xef   : > { %923 = vst.msk [vmem:[#allocation2 + $0x80] sm:$0xff] %vm906_vm6, %v2534_v18  ;;  %924 = vst.msk [vmem:[#allocation2 + $0x88] sm:$0xff] %vm906_vm6, %v2535_v56  ;;  %v2550_v41 = vunpack.i.h.bf16 %v2548_v4  ;;  %v2549_v42 = vunpack.i.l.bf16 %v2548_v4  ;;  %v306_v56 = vunpack.c.l.bf16 %v252_v44 }
  0xf0   : > { %v2543_v3 = vpop.permute.xlu0 %2542  ;;  %2837 = vrot.lane.b32.xlu1 %v3518_v6, %s3060_s18 }
  0xf1   : > { %929 = vst.msk [vmem:[#allocation2 + $0xb0] sm:$0xff] %vm906_vm6, %v2549_v42  ;;  %930 = vst.msk [vmem:[#allocation2 + $0xb8] sm:$0xff] %vm906_vm6, %v2550_v41  ;;  %v2545_v49 = vunpack.i.h.bf16 %v2543_v3  ;;  %v2544_v25 = vunpack.i.l.bf16 %v2543_v3  ;;  %v2926_v3 = vpack.i.bf16 %v4028_v13, %v4026_v12 }
  0xf2   : > { %2832 = vrot.lane.b32.xlu0 %v4447_v27, %s3060_s18  ;;  %v2558_v7 = vpop.permute.xlu1 %2557 }
  0xf3   : > { %927 = vst.msk [vmem:[#allocation2 + $0xa0] sm:$0xff] %vm906_vm6, %v2544_v25  ;;  %928 = vst.msk [vmem:[#allocation2 + $0xa8] sm:$0xff] %vm906_vm6, %v2545_v49  ;;  %v2560_v38 = vunpack.i.h.bf16 %v2558_v7  ;;  %v2559_v52 = vunpack.i.l.bf16 %v2558_v7  ;;  %v1340_v49 = vrot.slane %v4026_v12, 1 }
  0xf4   : > { %v2553_v63 = vpop.permute.xlu0 %2552  ;;  %2847 = vrot.lane.b32.xlu1 %v3506_v59, %s3060_s18 }
  0xf5   : > { %933 = vst.msk [vmem:[#allocation2 + $0xd0] sm:$0xff] %vm906_vm6, %v2559_v52  ;;  %934 = vst.msk [vmem:[#allocation2 + $0xd8] sm:$0xff] %vm906_vm6, %v2560_v38  ;;  %v2555_v6 = vunpack.i.h.bf16 %v2553_v63  ;;  %v2554_v55 = vunpack.i.l.bf16 %v2553_v63  ;;  %v1341_v38 = vrot.slane %v4028_v13, 1  ;;  %v1343_v52 = vrot.slane %v306_v56, 1 }
  0xf6   : > { %2842 = vrot.lane.b32.xlu0 %v4448_v8, %s3060_s18  ;;  %v2568_v61 = vpop.permute.xlu1 %2567 }
  0xf7   : > { %931 = vst.msk [vmem:[#allocation2 + $0xc0] sm:$0xff] %vm906_vm6, %v2554_v55  ;;  %932 = vst.msk [vmem:[#allocation2 + $0xc8] sm:$0xff] %vm906_vm6, %v2555_v6  ;;  %v2570_v58 = vunpack.i.h.bf16 %v2568_v61  ;;  %v2569_v40 = vunpack.i.l.bf16 %v2568_v61 }
  0xf8   : > { %v2563_v35 = vpop.permute.xlu0 %2562  ;;  %2857 = vrot.lane.b32.xlu1 %v3702_v28, %s3061_s27 }
  0xf9   : > { %937 = vst.msk [vmem:[#allocation2 + $0xf0] sm:$0xff] %vm906_vm6, %v2569_v40  ;;  %938 = vst.msk [vmem:[#allocation2 + $0xf8] sm:$0xff] %vm906_vm6, %v2570_v58  ;;  %v2565_v0 = vunpack.i.h.bf16 %v2563_v35  ;;  %v2564_v46 = vunpack.i.l.bf16 %v2563_v35  ;;  %v1342_v58 = vsel %vm388_vm0, %v1340_v49, %v1341_v38 }
  0xfa   : > { %2852 = vrot.lane.b32.xlu0 %v3588_v26, %s3061_s27  ;;  %v2578_v19 = vpop.permute.xlu1 %2577 }
  0xfb   : > { %935 = vst.msk [vmem:[#allocation2 + $0xe0] sm:$0xff] %vm906_vm6, %v2564_v46  ;;  %936 = vst.msk [vmem:[#allocation2 + $0xe8] sm:$0xff] %vm906_vm6, %v2565_v0  ;;  %v2580_v24 = vunpack.i.h.bf16 %v2578_v19  ;;  %v2579_v34 = vunpack.i.l.bf16 %v2578_v19 }
  0xfc   : > { %v2573_v17 = vpop.permute.xlu0 %2572  ;;  %2867 = vrot.lane.b32.xlu1 %v3698_v60, %s3061_s27 }
  0xfd   : > { %1058 = vst.msk [vmem:[#allocation2 + $0x80] sm:$0xff] %vm1041_vm7, %v2579_v34  ;;  %1059 = vst.msk [vmem:[#allocation2 + $0x88] sm:$0xff] %vm1041_vm7, %v2580_v24  ;;  %v2575_v28 = vunpack.i.h.bf16 %v2573_v17  ;;  %v2574_v54 = vunpack.i.l.bf16 %v2573_v17  ;;  %v1474_v24 = vrot.slane %v4026_v12, 2  ;;  %v1475_v17 = vrot.slane %v4028_v13, 2 }
  0xfe   : > { %2862 = vrot.lane.b32.xlu0 %v3582_v33, %s3061_s27  ;;  %v2588_v26 = vpop.permute.xlu1 %2587 }
  0xff   : > { %1042 = vst.msk [vmem:[#allocation2] sm:$0xff] %vm1041_vm7, %v2574_v54  ;;  %1043 = vst.msk [vmem:[#allocation2 + $0x8] sm:$0xff] %vm1041_vm7, %v2575_v28  ;;  %v2590_v5 = vunpack.i.h.bf16 %v2588_v26  ;;  %v2589_v43 = vunpack.i.l.bf16 %v2588_v26  ;;  %v1477_v28 = vrot.slane %v306_v56, 2 }
 0x100   : > { %v2583_v27 = vpop.permute.xlu0 %2582  ;;  %2877 = vrot.lane.b32.xlu1 %v3506_v59, %s3057_s7 }
 0x101   : > { %1060 = vst.msk [vmem:[#allocation2 + $0x90] sm:$0xff] %vm1041_vm7, %v2589_v43  ;;  %1061 = vst.msk [vmem:[#allocation2 + $0x98] sm:$0xff] %vm1041_vm7, %v2590_v5  ;;  %v2585_v45 = vunpack.i.h.bf16 %v2583_v27  ;;  %v2584_v9 = vunpack.i.l.bf16 %v2583_v27 }
 0x102   : > { %2872 = vrot.lane.b32.xlu0 %v4448_v8, %s3057_s7  ;;  %v2598_v32 = vpop.permute.xlu1 %2597 }
 0x103   : > { %1044 = vst.msk [vmem:[#allocation2 + $0x10] sm:$0xff] %vm1041_vm7, %v2584_v9  ;;  %1045 = vst.msk [vmem:[#allocation2 + $0x18] sm:$0xff] %vm1041_vm7, %v2585_v45  ;;  %v2600_v47 = vunpack.i.h.bf16 %v2598_v32  ;;  %v2599_v62 = vunpack.i.l.bf16 %v2598_v32  ;;  %v1476_v45 = vsel %vm598_vm2, %v1474_v24, %v1475_v17  ;;  %v1478_v9 = vsel %vm598_vm2, %v1475_v17, %v1477_v28 }
 0x104   : > { %v2593_v23 = vpop.permute.xlu0 %2592  ;;  %2887 = vrot.lane.b32.xlu1 %v3761_v22, %s3057_s7 }
 0x105   : > { %1192 = vst.msk [vmem:[#allocation2 + $0x80] sm:$0xff] %vm1175_vm8, %v2599_v62  ;;  %1193 = vst.msk [vmem:[#allocation2 + $0x88] sm:$0xff] %vm1175_vm8, %v2600_v47  ;;  %v2595_v59 = vunpack.i.h.bf16 %v2593_v23  ;;  %v2594_v53 = vunpack.i.l.bf16 %v2593_v23 }
 0x106   : > { %2882 = vrot.lane.b32.xlu0 %v4449_v57, %s3057_s7  ;;  %v2608_v11 = vpop.permute.xlu1 %2607  ;;  %s2156_s7 = sshll.u32 %s3044_s15, 12 }
 0x107   : > { %1176 = vst.msk [vmem:[#allocation2] sm:$0xff] %vm1175_vm8, %v2594_v53  ;;  %1177 = vst.msk [vmem:[#allocation2 + $0x8] sm:$0xff] %vm1175_vm8, %v2595_v59  ;;  %v2610_v2 = vunpack.i.h.bf16 %v2608_v11  ;;  %v2609_v10 = vunpack.i.l.bf16 %v2608_v11  ;;  %v2966_v59 = vpack.i.bf16 %v1478_v9, %v1476_v45  ;;  %s4300_s10 = scalar_lea.hbm %s4358_s3, %s2156_s7 }
 0x108   : > { %v2603_v1 = vpop.permute.xlu0 %2602  ;;  %2897 = vrot.lane.b32.xlu1 %v3698_v60, %s3058_s8 }
 0x109   : > { %1194 = vst.msk [vmem:[#allocation2 + $0x90] sm:$0xff] %vm1175_vm8, %v2609_v10  ;;  %1195 = vst.msk [vmem:[#allocation2 + $0x98] sm:$0xff] %vm1175_vm8, %v2610_v2  ;;  %v2605_v48 = vunpack.i.h.bf16 %v2603_v1  ;;  %v2604_v51 = vunpack.i.l.bf16 %v2603_v1 }
 0x10a   : > { %2892 = vrot.lane.b32.xlu0 %v3582_v33, %s3058_s8  ;;  %v2618_v31 = vpop.permute.xlu1 %2617 }
 0x10b   : > { %1178 = vst.msk [vmem:[#allocation2 + $0x10] sm:$0xff] %vm1175_vm8, %v2604_v51  ;;  %1179 = vst.msk [vmem:[#allocation2 + $0x18] sm:$0xff] %vm1175_vm8, %v2605_v48  ;;  %v2620_v37 = vunpack.i.h.bf16 %v2618_v31  ;;  %v2619_v50 = vunpack.i.l.bf16 %v2618_v31 }
 0x10c   : > { %v2613_v60 = vpop.permute.xlu0 %2612  ;;  %2907 = vrot.lane.b32.xlu1 %v3773_v29, %s3058_s8 }
 0x10d   : > { %1323 = vst.msk [vmem:[#allocation2 + $0x80] sm:$0xff] %vm1306_vm9, %v2619_v50  ;;  %1324 = vst.msk [vmem:[#allocation2 + $0x88] sm:$0xff] %vm1306_vm9, %v2620_v37  ;;  %v2615_v33 = vunpack.i.h.bf16 %v2613_v60  ;;  %v2614_v20 = vunpack.i.l.bf16 %v2613_v60 }
 0x10e   : > { %2902 = vrot.lane.b32.xlu0 %v3614_v15, %s3058_s8  ;;  %v2628_v18 = vpop.permute.xlu1 %2627  ;;  %s2042_s8 = sshll.u32 %s4238_s6, 4  ;;  %s4303_s8 = int_to_ptr.vmem [resolvable:$true] %s2042_s8 }
 0x10f   : > { %1307 = vst.msk [vmem:[#allocation2] sm:$0xff] %vm1306_vm9, %v2614_v20  ;;  %1308 = vst.msk [vmem:[#allocation2 + $0x8] sm:$0xff] %vm1306_vm9, %v2615_v33  ;;  %v2630_v4 = vunpack.i.h.bf16 %v2628_v18  ;;  %v2629_v41 = vunpack.i.l.bf16 %v2628_v18  ;;  %p2981_p1 = scmp.lt.s32.totalorder %s4303_s8, %s2979_s21 }
 0x110   : > { %v2623_v42 = vpop.permute.xlu0 %2622  ;;  %2917 = vrot.lane.b32.xlu1 %v3753_v39, %s3059_s9 }
 0x111   : > { %1325 = vst.msk [vmem:[#allocation2 + $0x90] sm:$0xff] %vm1306_vm9, %v2629_v41  ;;  %1326 = vst.msk [vmem:[#allocation2 + $0x98] sm:$0xff] %vm1306_vm9, %v2630_v4  ;;  %v2625_v25 = vunpack.i.h.bf16 %v2623_v42  ;;  %v2624_v7 = vunpack.i.l.bf16 %v2623_v42 }
 0x112   : > { %2912 = vrot.lane.b32.xlu0 %v3729_v30, %s3059_s9  ;;  %v2638_v63 = vpop.permute.xlu1 %2637  ;;  %v1344_v30 = vsel %vm388_vm0, %v1341_v38, %v1343_v52 }
 0x113   : > { %1309 = vst.msk [vmem:[#allocation2 + $0x10] sm:$0xff] %vm1306_vm9, %v2624_v7  ;;  %1310 = vst.msk [vmem:[#allocation2 + $0x18] sm:$0xff] %vm1306_vm9, %v2625_v25  ;;  %v2640_v39 = vunpack.i.h.bf16 %v2638_v63  ;;  %v2639_v6 = vunpack.i.l.bf16 %v2638_v63  ;;  %v2946_v19 = vpack.i.bf16 %v1344_v30, %v1342_v58 }
 0x114   : > { %v2633_v55 = vpop.permute.xlu0 %2632  ;;  %2927 = vrot.lane.b32.xlu1 %v2926_v3, %s3059_s9 }
 0x115   : > { %1458 = vst.msk [vmem:[#allocation2 + $0x80] sm:$0xff] %vm1441_vm10, %v2639_v6  ;;  %1459 = vst.msk [vmem:[#allocation2 + $0x88] sm:$0xff] %vm1441_vm10, %v2640_v39  ;;  %v2635_v8 = vunpack.i.h.bf16 %v2633_v55  ;;  %v2634_v61 = vunpack.i.l.bf16 %v2633_v55 }
 0x116   : > { %2922 = vrot.lane.b32.xlu0 %v3739_v21, %s3059_s9  ;;  %v2648_v40 = vpop.permute.xlu1 %2647 }
 0x117   : > { %1442 = vst.msk [vmem:[#allocation2] sm:$0xff] %vm1441_vm10, %v2634_v61  ;;  %1443 = vst.msk [vmem:[#allocation2 + $0x8] sm:$0xff] %vm1441_vm10, %v2635_v8  ;;  %v2650_v35 = vunpack.i.h.bf16 %v2648_v40  ;;  %v2649_v0 = vunpack.i.l.bf16 %v2648_v40 }
 0x118   : > { %v2643_v46 = vpop.permute.xlu0 %2642  ;;  %2937 = vrot.lane.b32.xlu1 %v3761_v22, %s3060_s18 }
 0x119   : > { %1460 = vst.msk [vmem:[#allocation2 + $0x90] sm:$0xff] %vm1441_vm10, %v2649_v0  ;;  %1461 = vst.msk [vmem:[#allocation2 + $0x98] sm:$0xff] %vm1441_vm10, %v2650_v35  ;;  %v2645_v34 = vunpack.i.h.bf16 %v2643_v46  ;;  %v2644_v21 = vunpack.i.l.bf16 %v2643_v46 }
 0x11a   : > { %2932 = vrot.lane.b32.xlu0 %v4449_v57, %s3060_s18  ;;  %v2658_v54 = vpop.permute.xlu1 %2657 }
 0x11b   : > { %1444 = vst.msk [vmem:[#allocation2 + $0x10] sm:$0xff] %vm1441_vm10, %v2644_v21  ;;  %1445 = vst.msk [vmem:[#allocation2 + $0x18] sm:$0xff] %vm1441_vm10, %v2645_v34  ;;  %v2660_v22 = vunpack.i.h.bf16 %v2658_v54  ;;  %v2659_v26 = vunpack.i.l.bf16 %v2658_v54 }
 0x11c   : > { %v2653_v5 = vpop.permute.xlu0 %2652  ;;  %2947 = vrot.lane.b32.xlu1 %v2946_v19, %s3060_s18 }
 0x11d   : > { %1592 = vst.msk [vmem:[#allocation2 + $0x80] sm:$0xff] %vm1575_vm11, %v2659_v26  ;;  %1593 = vst.msk [vmem:[#allocation2 + $0x88] sm:$0xff] %vm1575_vm11, %v2660_v22  ;;  %v2655_v43 = vunpack.i.h.bf16 %v2653_v5  ;;  %v2654_v27 = vunpack.i.l.bf16 %v2653_v5 }
 0x11e   : > { %2942 = vrot.lane.b32.xlu0 %v4437_v36, %s3060_s18  ;;  %v2668_v32 = vpop.permute.xlu1 %2667  ;;  %s2974_s18 = scalar_lea.vmem %s4303_s8, 4096 }
 0x11f   : > { %1576 = vst.msk [vmem:[#allocation2] sm:$0xff] %vm1575_vm11, %v2654_v27  ;;  %1577 = vst.msk [vmem:[#allocation2 + $0x8] sm:$0xff] %vm1575_vm11, %v2655_v43  ;;  %v2670_v47 = vunpack.i.h.bf16 %v2668_v32  ;;  %v2669_v62 = vunpack.i.l.bf16 %v2668_v32  ;;  %p2975_p12 = scmp.ne.s32.totalorder %s4303_s8, %s2974_s18  ;;  %p2982_p2 = scmp.lt.s32.totalorder %s2980_s23, %s2974_s18 }
 0x120   : > { %v2663_v23 = vpop.permute.xlu0 %2662  ;;  %2957 = vrot.lane.b32.xlu1 %v3773_v29, %s3061_s27 }
 0x121   : > { %1594 = vst.msk [vmem:[#allocation2 + $0x90] sm:$0xff] %vm1575_vm11, %v2669_v62  ;;  %1595 = vst.msk [vmem:[#allocation2 + $0x98] sm:$0xff] %vm1575_vm11, %v2670_v47  ;;  %v2665_v53 = vunpack.i.h.bf16 %v2663_v23  ;;  %v2664_v57 = vunpack.i.l.bf16 %v2663_v23  ;;  %p2976_p13 = pnand %p2975_p12, %p3124_p4  ;;  %p2983_p3 = por %p2982_p2, %p2981_p1 }
 0x122   : > { %2952 = vrot.lane.b32.xlu0 %v3614_v15, %s3061_s27  ;;  %v2678_v36 = vpop.permute.xlu1 %2677 }
 0x123   : > { %1578 = vst.msk [vmem:[#allocation2 + $0x10] sm:$0xff] %vm1575_vm11, %v2664_v57  ;;  %1579 = vst.msk [vmem:[#allocation2 + $0x18] sm:$0xff] %vm1575_vm11, %v2665_v53  ;;  %v2680_v11 = vunpack.i.h.bf16 %v2678_v36  ;;  %v2679_v2 = vunpack.i.l.bf16 %v2678_v36  ;;  %p2977_p0 = pneg %p2976_p13 }
 0x124   : > { %v2673_v10 = vpop.permute.xlu0 %2672  ;;  %2967 = vrot.lane.b32.xlu1 %v2966_v59, %s3061_s27  ;;  %v1624_v29 = vld [vmem:[#allocation2 + $0x80] sm:$0xff]  ;;  %v1625_v1 = vld [vmem:[#allocation2 + $0x88] sm:$0xff] }
 0x125   : > { %1062 = vst.msk [vmem:[#allocation2 + $0xa0] sm:$0xff] %vm1041_vm7, %v2679_v2  ;;  %1063 = vst.msk [vmem:[#allocation2 + $0xa8] sm:$0xff] %vm1041_vm7, %v2680_v11  ;;  %v2675_v48 = vunpack.i.h.bf16 %v2673_v10  ;;  %v2674_v51 = vunpack.i.l.bf16 %v2673_v10  ;;  %v1648_v15 = vpack.c.bf16 %v1625_v1, %v1624_v29  ;;  %p2984_p5 = pnand %p2983_p3, %p2977_p0 }
 0x126   : > { %2962 = vrot.lane.b32.xlu0 %v3612_v14, %s3061_s27  ;;  %v2688_v16 = vpop.permute.xlu1 %2687  ;;  %v1608_v31 = vld [vmem:[#allocation2] sm:$0xff]  ;;  %v1609_v44 = vld [vmem:[#allocation2 + $0x8] sm:$0xff] }
 0x127   : > { %1046 = vst.msk [vmem:[#allocation2 + $0x20] sm:$0xff] %vm1041_vm7, %v2674_v51  ;;  %1047 = vst.msk [vmem:[#allocation2 + $0x28] sm:$0xff] %vm1041_vm7, %v2675_v48  ;;  %v2690_v37 = vunpack.i.h.bf16 %v2688_v16  ;;  %v2689_v50 = vunpack.i.l.bf16 %v2688_v16  ;;  %v1640_v60 = vpack.c.bf16 %v1609_v44, %v1608_v31  ;;  %2242 = vmatprep.mubr.msk.bf16.mxu1 %vm1683_vm12, %v1648_v15 }
 0x128   : > { %v2683_v12 = vpop.permute.xlu0 %2682  ;;  %v1626_v13 = vld [vmem:[#allocation2 + $0x90] sm:$0xff]  ;;  %v1627_v33 = vld [vmem:[#allocation2 + $0x98] sm:$0xff] }
 0x129   : > { %1064 = vst.msk [vmem:[#allocation2 + $0xb0] sm:$0xff] %vm1041_vm7, %v2689_v50  ;;  %1065 = vst.msk [vmem:[#allocation2 + $0xb8] sm:$0xff] %vm1041_vm7, %v2690_v37  ;;  %v2685_v14 = vunpack.i.h.bf16 %v2683_v12  ;;  %v2684_v20 = vunpack.i.l.bf16 %v2683_v12  ;;  %2226 = vmatprep.mubr.msk.bf16.mxu0 %vm1683_vm12, %v1640_v60  ;;  %v1649_v56 = vpack.c.bf16 %v1627_v33, %v1626_v13 }
 0x12a   : > { %v2698_v18 = vpop.permute.xlu1 %2697  ;;  %v1610_v4 = vld [vmem:[#allocation2 + $0x10] sm:$0xff]  ;;  %v1611_v41 = vld [vmem:[#allocation2 + $0x18] sm:$0xff] }
 0x12b   : > { %1049 = vst.msk [vmem:[#allocation2 + $0x38] sm:$0xff] %vm1041_vm7, %v2685_v14  ;;  %1048 = vst.msk [vmem:[#allocation2 + $0x30] sm:$0xff] %vm1041_vm7, %v2684_v20  ;;  %v2700_v42 = vunpack.i.h.bf16 %v2698_v18  ;;  %v2699_v3 = vunpack.i.l.bf16 %v2698_v18  ;;  %v1641_v49 = vpack.c.bf16 %v1611_v41, %v1610_v4  ;;  %2243 = vmatmul.mubr.msk.bf16.vlgmr.msra.gmra.mrb[0].mxu1 %vm1683_vm12, %v1649_v56 }
 0x12c   : > { %v2693_v25 = vpop.permute.xlu0 %2692 }
 0x12d   : > { %1196 = vst.msk [vmem:[#allocation2 + $0xa0] sm:$0xff] %vm1175_vm8, %v2699_v3  ;;  %1197 = vst.msk [vmem:[#allocation2 + $0xa8] sm:$0xff] %vm1175_vm8, %v2700_v42  ;;  %v2695_v7 = vunpack.i.h.bf16 %v2693_v25  ;;  %v2694_v38 = vunpack.i.l.bf16 %v2693_v25  ;;  %2227 = vmatmul.mubr.msk.bf16.vlgmr.msra.gmra.mrb[0].mxu0 %vm1683_vm12, %v1641_v49 }
 0x12e   : > { %v2708_v52 = vpop.permute.xlu1 %2707 }
 0x12f   : > { %1180 = vst.msk [vmem:[#allocation2 + $0x20] sm:$0xff] %vm1175_vm8, %v2694_v38  ;;  %1181 = vst.msk [vmem:[#allocation2 + $0x28] sm:$0xff] %vm1175_vm8, %v2695_v7  ;;  %v2710_v63 = vunpack.i.h.bf16 %v2708_v52  ;;  %v2709_v39 = vunpack.i.l.bf16 %v2708_v52 }
 0x130   : > { %v2703_v6 = vpop.permute.xlu0 %2702 }
 0x131   : > { %1198 = vst.msk [vmem:[#allocation2 + $0xb0] sm:$0xff] %vm1175_vm8, %v2709_v39  ;;  %1199 = vst.msk [vmem:[#allocation2 + $0xb8] sm:$0xff] %vm1175_vm8, %v2710_v63  ;;  %v2705_v55 = vunpack.i.h.bf16 %v2703_v6  ;;  %v2704_v8 = vunpack.i.l.bf16 %v2703_v6 }
 0x132   : > { %v2718_v61 = vpop.permute.xlu1 %2717 }
 0x133   : > { %1182 = vst.msk [vmem:[#allocation2 + $0x30] sm:$0xff] %vm1175_vm8, %v2704_v8  ;;  %1183 = vst.msk [vmem:[#allocation2 + $0x38] sm:$0xff] %vm1175_vm8, %v2705_v55  ;;  %v2720_v58 = vunpack.i.h.bf16 %v2718_v61  ;;  %v2719_v30 = vunpack.i.l.bf16 %v2718_v61 }
 0x134   : > { %v2713_v40 = vpop.permute.xlu0 %2712 }
 0x135   : > { %1327 = vst.msk [vmem:[#allocation2 + $0xa0] sm:$0xff] %vm1306_vm9, %v2719_v30  ;;  %1328 = vst.msk [vmem:[#allocation2 + $0xa8] sm:$0xff] %vm1306_vm9, %v2720_v58  ;;  %v2715_v35 = vunpack.i.h.bf16 %v2713_v40  ;;  %v2714_v0 = vunpack.i.l.bf16 %v2713_v40 }
 0x136   : > { %v2728_v46 = vpop.permute.xlu1 %2727 }
 0x137   : > { %1311 = vst.msk [vmem:[#allocation2 + $0x20] sm:$0xff] %vm1306_vm9, %v2714_v0  ;;  %1312 = vst.msk [vmem:[#allocation2 + $0x28] sm:$0xff] %vm1306_vm9, %v2715_v35  ;;  %v2730_v19 = vunpack.i.h.bf16 %v2728_v46  ;;  %v2729_v24 = vunpack.i.l.bf16 %v2728_v46 }
 0x138   : > { %v2723_v34 = vpop.permute.xlu0 %2722 }
 0x139   : > { %1329 = vst.msk [vmem:[#allocation2 + $0xb0] sm:$0xff] %vm1306_vm9, %v2729_v24  ;;  %1330 = vst.msk [vmem:[#allocation2 + $0xb8] sm:$0xff] %vm1306_vm9, %v2730_v19  ;;  %v2725_v21 = vunpack.i.h.bf16 %v2723_v34  ;;  %v2724_v17 = vunpack.i.l.bf16 %v2723_v34 }
 0x13a   : > { %v2738_v28 = vpop.permute.xlu1 %2737 }
 0x13b   : > { %1313 = vst.msk [vmem:[#allocation2 + $0x30] sm:$0xff] %vm1306_vm9, %v2724_v17  ;;  %1314 = vst.msk [vmem:[#allocation2 + $0x38] sm:$0xff] %vm1306_vm9, %v2725_v21  ;;  %v2740_v54 = vunpack.i.h.bf16 %v2738_v28  ;;  %v2739_v22 = vunpack.i.l.bf16 %v2738_v28 }
 0x13c   : > { %v2733_v26 = vpop.permute.xlu0 %2732 }
 0x13d   : > { %1462 = vst.msk [vmem:[#allocation2 + $0xa0] sm:$0xff] %vm1441_vm10, %v2739_v22  ;;  %1463 = vst.msk [vmem:[#allocation2 + $0xa8] sm:$0xff] %vm1441_vm10, %v2740_v54  ;;  %v2735_v5 = vunpack.i.h.bf16 %v2733_v26  ;;  %v2734_v43 = vunpack.i.l.bf16 %v2733_v26 }
 0x13e   : > { %v2748_v27 = vpop.permute.xlu1 %2747 }
 0x13f   : > { %1446 = vst.msk [vmem:[#allocation2 + $0x20] sm:$0xff] %vm1441_vm10, %v2734_v43  ;;  %1447 = vst.msk [vmem:[#allocation2 + $0x28] sm:$0xff] %vm1441_vm10, %v2735_v5  ;;  %v2750_v45 = vunpack.i.h.bf16 %v2748_v27  ;;  %v2749_v9 = vunpack.i.l.bf16 %v2748_v27 }
 0x140   : > { %v2743_v32 = vpop.permute.xlu0 %2742 }
 0x141   : > { %1464 = vst.msk [vmem:[#allocation2 + $0xb0] sm:$0xff] %vm1441_vm10, %v2749_v9  ;;  %1465 = vst.msk [vmem:[#allocation2 + $0xb8] sm:$0xff] %vm1441_vm10, %v2750_v45  ;;  %v2745_v47 = vunpack.i.h.bf16 %v2743_v32  ;;  %v2744_v62 = vunpack.i.l.bf16 %v2743_v32 }
 0x142   : > { %v2758_v23 = vpop.permute.xlu1 %2757 }
 0x143   : > { %1448 = vst.msk [vmem:[#allocation2 + $0x30] sm:$0xff] %vm1441_vm10, %v2744_v62  ;;  %1449 = vst.msk [vmem:[#allocation2 + $0x38] sm:$0xff] %vm1441_vm10, %v2745_v47  ;;  %v2760_v59 = vunpack.i.h.bf16 %v2758_v23  ;;  %v2759_v53 = vunpack.i.l.bf16 %v2758_v23 }
 0x144   : > { %v2753_v57 = vpop.permute.xlu0 %2752 }
 0x145   : > { %1596 = vst.msk [vmem:[#allocation2 + $0xa0] sm:$0xff] %vm1575_vm11, %v2759_v53  ;;  %1597 = vst.msk [vmem:[#allocation2 + $0xa8] sm:$0xff] %vm1575_vm11, %v2760_v59  ;;  %v2755_v36 = vunpack.i.h.bf16 %v2753_v57  ;;  %v2754_v11 = vunpack.i.l.bf16 %v2753_v57 }
 0x146   : > { %v2768_v2 = vpop.permute.xlu1 %2767 }
 0x147   : > { %1580 = vst.msk [vmem:[#allocation2 + $0x20] sm:$0xff] %vm1575_vm11, %v2754_v11  ;;  %1581 = vst.msk [vmem:[#allocation2 + $0x28] sm:$0xff] %vm1575_vm11, %v2755_v36  ;;  %v2770_v10 = vunpack.i.h.bf16 %v2768_v2  ;;  %v2769_v29 = vunpack.i.l.bf16 %v2768_v2 }
 0x148   : > { %v2763_v1 = vpop.permute.xlu0 %2762 }
 0x149   : > { %1598 = vst.msk [vmem:[#allocation2 + $0xb0] sm:$0xff] %vm1575_vm11, %v2769_v29  ;;  %1599 = vst.msk [vmem:[#allocation2 + $0xb8] sm:$0xff] %vm1575_vm11, %v2770_v10  ;;  %v2765_v48 = vunpack.i.h.bf16 %v2763_v1  ;;  %v2764_v51 = vunpack.i.l.bf16 %v2763_v1 }
 0x14a   : > { %v2778_v15 = vpop.permute.xlu1 %2777 }
 0x14b   : > { %1582 = vst.msk [vmem:[#allocation2 + $0x30] sm:$0xff] %vm1575_vm11, %v2764_v51  ;;  %1583 = vst.msk [vmem:[#allocation2 + $0x38] sm:$0xff] %vm1575_vm11, %v2765_v48  ;;  %v2780_v16 = vunpack.i.h.bf16 %v2778_v15  ;;  %v2779_v31 = vunpack.i.l.bf16 %v2778_v15 }
 0x14c   : > { %v2773_v44 = vpop.permute.xlu0 %2772  ;;  %v1628_v37 = vld [vmem:[#allocation2 + $0xa0] sm:$0xff]  ;;  %v1629_v50 = vld [vmem:[#allocation2 + $0xa8] sm:$0xff] }
 0x14d   : > { %1066 = vst.msk [vmem:[#allocation2 + $0xc0] sm:$0xff] %vm1041_vm7, %v2779_v31  ;;  %1067 = vst.msk [vmem:[#allocation2 + $0xc8] sm:$0xff] %vm1041_vm7, %v2780_v16  ;;  %v2775_v60 = vunpack.i.h.bf16 %v2773_v44  ;;  %v2774_v12 = vunpack.i.l.bf16 %v2773_v44  ;;  %v1650_v13 = vpack.c.bf16 %v1629_v50, %v1628_v37 }
 0x14e   : > { %v2788_v33 = vpop.permute.xlu1 %2787  ;;  %v1612_v14 = vld [vmem:[#allocation2 + $0x20] sm:$0xff]  ;;  %v1613_v20 = vld [vmem:[#allocation2 + $0x28] sm:$0xff] }
 0x14f   : > { %1050 = vst.msk [vmem:[#allocation2 + $0x40] sm:$0xff] %vm1041_vm7, %v2774_v12  ;;  %1051 = vst.msk [vmem:[#allocation2 + $0x48] sm:$0xff] %vm1041_vm7, %v2775_v60  ;;  %v2790_v56 = vunpack.i.h.bf16 %v2788_v33  ;;  %v2789_v18 = vunpack.i.l.bf16 %v2788_v33  ;;  %v1642_v4 = vpack.c.bf16 %v1613_v20, %v1612_v14  ;;  %2246 = vmatprep.mubr.msk.bf16.mxu1 %vm1683_vm12, %v1650_v13 }
 0x150   : > { %v2783_v41 = vpop.permute.xlu0 %2782  ;;  %v1630_v42 = vld [vmem:[#allocation2 + $0xb0] sm:$0xff]  ;;  %v1631_v3 = vld [vmem:[#allocation2 + $0xb8] sm:$0xff] }
 0x151   : > { %1068 = vst.msk [vmem:[#allocation2 + $0xd0] sm:$0xff] %vm1041_vm7, %v2789_v18  ;;  %1069 = vst.msk [vmem:[#allocation2 + $0xd8] sm:$0xff] %vm1041_vm7, %v2790_v56  ;;  %v2785_v49 = vunpack.i.h.bf16 %v2783_v41  ;;  %v2784_v25 = vunpack.i.l.bf16 %v2783_v41  ;;  %2230 = vmatprep.mubr.msk.bf16.mxu0 %vm1683_vm12, %v1642_v4  ;;  %v1651_v7 = vpack.c.bf16 %v1631_v3, %v1630_v42 }
 0x152   : > { %v2798_v38 = vpop.permute.xlu1 %2797  ;;  %v1614_v52 = vld [vmem:[#allocation2 + $0x30] sm:$0xff]  ;;  %v1615_v63 = vld [vmem:[#allocation2 + $0x38] sm:$0xff] }
 0x153   : > { %1053 = vst.msk [vmem:[#allocation2 + $0x58] sm:$0xff] %vm1041_vm7, %v2785_v49  ;;  %1052 = vst.msk [vmem:[#allocation2 + $0x50] sm:$0xff] %vm1041_vm7, %v2784_v25  ;;  %v2800_v39 = vunpack.i.h.bf16 %v2798_v38  ;;  %v2799_v6 = vunpack.i.l.bf16 %v2798_v38  ;;  %v1643_v55 = vpack.c.bf16 %v1615_v63, %v1614_v52  ;;  %2247 = vmatmul.mubr.msk.bf16.gmra.mrb[4].mxu1 %vm1683_vm12, %v1651_v7 }
 0x154   : > { %v2793_v8 = vpop.permute.xlu0 %2792 }
 0x155   : > { %1200 = vst.msk [vmem:[#allocation2 + $0xc0] sm:$0xff] %vm1175_vm8, %v2799_v6  ;;  %1201 = vst.msk [vmem:[#allocation2 + $0xc8] sm:$0xff] %vm1175_vm8, %v2800_v39  ;;  %v2795_v61 = vunpack.i.h.bf16 %v2793_v8  ;;  %v2794_v58 = vunpack.i.l.bf16 %v2793_v8  ;;  %2231 = vmatmul.mubr.msk.bf16.gmra.mrb[4].mxu0 %vm1683_vm12, %v1643_v55 }
 0x156   : > { %v2808_v30 = vpop.permute.xlu1 %2807 }
 0x157   : > { %1184 = vst.msk [vmem:[#allocation2 + $0x40] sm:$0xff] %vm1175_vm8, %v2794_v58  ;;  %1185 = vst.msk [vmem:[#allocation2 + $0x48] sm:$0xff] %vm1175_vm8, %v2795_v61  ;;  %v2810_v40 = vunpack.i.h.bf16 %v2808_v30  ;;  %v2809_v35 = vunpack.i.l.bf16 %v2808_v30 }
 0x158   : > { %v2803_v0 = vpop.permute.xlu0 %2802 }
 0x159   : > { %1202 = vst.msk [vmem:[#allocation2 + $0xd0] sm:$0xff] %vm1175_vm8, %v2809_v35  ;;  %1203 = vst.msk [vmem:[#allocation2 + $0xd8] sm:$0xff] %vm1175_vm8, %v2810_v40  ;;  %v2805_v46 = vunpack.i.h.bf16 %v2803_v0  ;;  %v2804_v19 = vunpack.i.l.bf16 %v2803_v0 }
 0x15a   : > { %v2818_v24 = vpop.permute.xlu1 %2817 }
 0x15b   : > { %1186 = vst.msk [vmem:[#allocation2 + $0x50] sm:$0xff] %vm1175_vm8, %v2804_v19  ;;  %1187 = vst.msk [vmem:[#allocation2 + $0x58] sm:$0xff] %vm1175_vm8, %v2805_v46  ;;  %v2820_v34 = vunpack.i.h.bf16 %v2818_v24  ;;  %v2819_v21 = vunpack.i.l.bf16 %v2818_v24 }
 0x15c   : > { %v2813_v17 = vpop.permute.xlu0 %2812 }
 0x15d   : > { %1331 = vst.msk [vmem:[#allocation2 + $0xc0] sm:$0xff] %vm1306_vm9, %v2819_v21  ;;  %1332 = vst.msk [vmem:[#allocation2 + $0xc8] sm:$0xff] %vm1306_vm9, %v2820_v34  ;;  %v2815_v28 = vunpack.i.h.bf16 %v2813_v17  ;;  %v2814_v54 = vunpack.i.l.bf16 %v2813_v17 }
 0x15e   : > { %v2828_v22 = vpop.permute.xlu1 %2827 }
 0x15f   : > { %1315 = vst.msk [vmem:[#allocation2 + $0x40] sm:$0xff] %vm1306_vm9, %v2814_v54  ;;  %1316 = vst.msk [vmem:[#allocation2 + $0x48] sm:$0xff] %vm1306_vm9, %v2815_v28  ;;  %v2830_v26 = vunpack.i.h.bf16 %v2828_v22  ;;  %v2829_v5 = vunpack.i.l.bf16 %v2828_v22 }
 0x160   : > { %v2823_v43 = vpop.permute.xlu0 %2822 }
 0x161   : > { %1333 = vst.msk [vmem:[#allocation2 + $0xd0] sm:$0xff] %vm1306_vm9, %v2829_v5  ;;  %1334 = vst.msk [vmem:[#allocation2 + $0xd8] sm:$0xff] %vm1306_vm9, %v2830_v26  ;;  %v2825_v27 = vunpack.i.h.bf16 %v2823_v43  ;;  %v2824_v45 = vunpack.i.l.bf16 %v2823_v43 }
 0x162   : > { %v2838_v9 = vpop.permute.xlu1 %2837 }
 0x163   : > { %1317 = vst.msk [vmem:[#allocation2 + $0x50] sm:$0xff] %vm1306_vm9, %v2824_v45  ;;  %1318 = vst.msk [vmem:[#allocation2 + $0x58] sm:$0xff] %vm1306_vm9, %v2825_v27  ;;  %v2840_v32 = vunpack.i.h.bf16 %v2838_v9  ;;  %v2839_v47 = vunpack.i.l.bf16 %v2838_v9 }
 0x164   : > { %v2833_v62 = vpop.permute.xlu0 %2832 }
 0x165   : > { %1466 = vst.msk [vmem:[#allocation2 + $0xc0] sm:$0xff] %vm1441_vm10, %v2839_v47  ;;  %1467 = vst.msk [vmem:[#allocation2 + $0xc8] sm:$0xff] %vm1441_vm10, %v2840_v32  ;;  %v2835_v23 = vunpack.i.h.bf16 %v2833_v62  ;;  %v2834_v59 = vunpack.i.l.bf16 %v2833_v62 }
 0x166   : > { %v2848_v53 = vpop.permute.xlu1 %2847 }
 0x167   : > { %1450 = vst.msk [vmem:[#allocation2 + $0x40] sm:$0xff] %vm1441_vm10, %v2834_v59  ;;  %1451 = vst.msk [vmem:[#allocation2 + $0x48] sm:$0xff] %vm1441_vm10, %v2835_v23  ;;  %v2850_v57 = vunpack.i.h.bf16 %v2848_v53  ;;  %v2849_v36 = vunpack.i.l.bf16 %v2848_v53 }
 0x168   : > { %v2843_v11 = vpop.permute.xlu0 %2842 }
 0x169   : > { %1468 = vst.msk [vmem:[#allocation2 + $0xd0] sm:$0xff] %vm1441_vm10, %v2849_v36  ;;  %1469 = vst.msk [vmem:[#allocation2 + $0xd8] sm:$0xff] %vm1441_vm10, %v2850_v57  ;;  %v2845_v2 = vunpack.i.h.bf16 %v2843_v11  ;;  %v2844_v10 = vunpack.i.l.bf16 %v2843_v11 }
 0x16a   : > { %v2858_v29 = vpop.permute.xlu1 %2857 }
 0x16b   : > { %1452 = vst.msk [vmem:[#allocation2 + $0x50] sm:$0xff] %vm1441_vm10, %v2844_v10  ;;  %1453 = vst.msk [vmem:[#allocation2 + $0x58] sm:$0xff] %vm1441_vm10, %v2845_v2  ;;  %v2860_v1 = vunpack.i.h.bf16 %v2858_v29  ;;  %v2859_v48 = vunpack.i.l.bf16 %v2858_v29 }
 0x16c   : > { %v2853_v51 = vpop.permute.xlu0 %2852 }
 0x16d   : > { %1600 = vst.msk [vmem:[#allocation2 + $0xc0] sm:$0xff] %vm1575_vm11, %v2859_v48  ;;  %1601 = vst.msk [vmem:[#allocation2 + $0xc8] sm:$0xff] %vm1575_vm11, %v2860_v1  ;;  %v2855_v15 = vunpack.i.h.bf16 %v2853_v51  ;;  %v2854_v16 = vunpack.i.l.bf16 %v2853_v51 }
 0x16e   : > { %v2868_v31 = vpop.permute.xlu1 %2867 }
 0x16f   : > { %1584 = vst.msk [vmem:[#allocation2 + $0x40] sm:$0xff] %vm1575_vm11, %v2854_v16  ;;  %1585 = vst.msk [vmem:[#allocation2 + $0x48] sm:$0xff] %vm1575_vm11, %v2855_v15  ;;  %v2870_v44 = vunpack.i.h.bf16 %v2868_v31  ;;  %v2869_v37 = vunpack.i.l.bf16 %v2868_v31 }
 0x170   : > { %v2863_v50 = vpop.permute.xlu0 %2862 }
 0x171   : > { %1602 = vst.msk [vmem:[#allocation2 + $0xd0] sm:$0xff] %vm1575_vm11, %v2869_v37  ;;  %1603 = vst.msk [vmem:[#allocation2 + $0xd8] sm:$0xff] %vm1575_vm11, %v2870_v44  ;;  %v2865_v60 = vunpack.i.h.bf16 %v2863_v50  ;;  %v2864_v12 = vunpack.i.l.bf16 %v2863_v50 }
 0x172   : > { %v2878_v13 = vpop.permute.xlu1 %2877 }
 0x173   : > { %1586 = vst.msk [vmem:[#allocation2 + $0x50] sm:$0xff] %vm1575_vm11, %v2864_v12  ;;  %1587 = vst.msk [vmem:[#allocation2 + $0x58] sm:$0xff] %vm1575_vm11, %v2865_v60  ;;  %v2880_v33 = vunpack.i.h.bf16 %v2878_v13  ;;  %v2879_v14 = vunpack.i.l.bf16 %v2878_v13 }
 0x174   : > { %v2873_v20 = vpop.permute.xlu0 %2872  ;;  %v1632_v56 = vld [vmem:[#allocation2 + $0xc0] sm:$0xff]  ;;  %v1633_v18 = vld [vmem:[#allocation2 + $0xc8] sm:$0xff] }
 0x175   : > { %1070 = vst.msk [vmem:[#allocation2 + $0xe0] sm:$0xff] %vm1041_vm7, %v2879_v14  ;;  %1071 = vst.msk [vmem:[#allocation2 + $0xe8] sm:$0xff] %vm1041_vm7, %v2880_v33  ;;  %v2875_v4 = vunpack.i.h.bf16 %v2873_v20  ;;  %v2874_v41 = vunpack.i.l.bf16 %v2873_v20  ;;  %v1652_v42 = vpack.c.bf16 %v1633_v18, %v1632_v56 }
 0x176   : > { %v2888_v3 = vpop.permute.xlu1 %2887  ;;  %v1616_v49 = vld [vmem:[#allocation2 + $0x40] sm:$0xff]  ;;  %v1617_v25 = vld [vmem:[#allocation2 + $0x48] sm:$0xff] }
 0x177   : > { %1054 = vst.msk [vmem:[#allocation2 + $0x60] sm:$0xff] %vm1041_vm7, %v2874_v41  ;;  %1055 = vst.msk [vmem:[#allocation2 + $0x68] sm:$0xff] %vm1041_vm7, %v2875_v4  ;;  %v2890_v7 = vunpack.i.h.bf16 %v2888_v3  ;;  %v2889_v38 = vunpack.i.l.bf16 %v2888_v3  ;;  %v1644_v52 = vpack.c.bf16 %v1617_v25, %v1616_v49  ;;  %2250 = vmatprep.mubr.msk.bf16.mxu1 %vm1683_vm12, %v1652_v42 }
 0x178   : > { %v2883_v63 = vpop.permute.xlu0 %2882  ;;  %v1634_v39 = vld [vmem:[#allocation2 + $0xd0] sm:$0xff]  ;;  %v1635_v6 = vld [vmem:[#allocation2 + $0xd8] sm:$0xff] }
 0x179   : > { %1072 = vst.msk [vmem:[#allocation2 + $0xf0] sm:$0xff] %vm1041_vm7, %v2889_v38  ;;  %1073 = vst.msk [vmem:[#allocation2 + $0xf8] sm:$0xff] %vm1041_vm7, %v2890_v7  ;;  %v2885_v55 = vunpack.i.h.bf16 %v2883_v63  ;;  %v2884_v8 = vunpack.i.l.bf16 %v2883_v63  ;;  %2234 = vmatprep.mubr.msk.bf16.mxu0 %vm1683_vm12, %v1644_v52  ;;  %v1653_v61 = vpack.c.bf16 %v1635_v6, %v1634_v39 }
 0x17a   : > { %v2898_v58 = vpop.permute.xlu1 %2897  ;;  %v1618_v30 = vld [vmem:[#allocation2 + $0x50] sm:$0xff]  ;;  %v1619_v40 = vld [vmem:[#allocation2 + $0x58] sm:$0xff] }
 0x17b   : > { %1057 = vst.msk [vmem:[#allocation2 + $0x78] sm:$0xff] %vm1041_vm7, %v2885_v55  ;;  %1056 = vst.msk [vmem:[#allocation2 + $0x70] sm:$0xff] %vm1041_vm7, %v2884_v8  ;;  %v2900_v35 = vunpack.i.h.bf16 %v2898_v58  ;;  %v2899_v0 = vunpack.i.l.bf16 %v2898_v58  ;;  %v1645_v46 = vpack.c.bf16 %v1619_v40, %v1618_v30  ;;  %2251 = vmatmul.mubr.msk.bf16.gmra.mrb[8].mxu1 %vm1683_vm12, %v1653_v61  ;;  %v4227_v61 = vld [vmem:[%s4357_s2] ss:$0 sm:$0xff] }
 0x17c   : > { %v2893_v19 = vpop.permute.xlu0 %2892 }
 0x17d   : > { %1204 = vst.msk [vmem:[#allocation2 + $0xe0] sm:$0xff] %vm1175_vm8, %v2899_v0  ;;  %1205 = vst.msk [vmem:[#allocation2 + $0xe8] sm:$0xff] %vm1175_vm8, %v2900_v35  ;;  %v2895_v24 = vunpack.i.h.bf16 %v2893_v19  ;;  %v2894_v34 = vunpack.i.l.bf16 %v2893_v19  ;;  %2235 = vmatmul.mubr.msk.bf16.gmra.mrb[8].mxu0 %vm1683_vm12, %v1645_v46 }
 0x17e   : > { %v2908_v21 = vpop.permute.xlu1 %2907 }
 0x17f   : > { %1188 = vst.msk [vmem:[#allocation2 + $0x60] sm:$0xff] %vm1175_vm8, %v2894_v34  ;;  %1189 = vst.msk [vmem:[#allocation2 + $0x68] sm:$0xff] %vm1175_vm8, %v2895_v24  ;;  %v2910_v17 = vunpack.i.h.bf16 %v2908_v21  ;;  %v2909_v28 = vunpack.i.l.bf16 %v2908_v21 }
 0x180   : > { %v2903_v54 = vpop.permute.xlu0 %2902 }
 0x181   : > { %1206 = vst.msk [vmem:[#allocation2 + $0xf0] sm:$0xff] %vm1175_vm8, %v2909_v28  ;;  %1207 = vst.msk [vmem:[#allocation2 + $0xf8] sm:$0xff] %vm1175_vm8, %v2910_v17  ;;  %v2905_v22 = vunpack.i.h.bf16 %v2903_v54  ;;  %v2904_v26 = vunpack.i.l.bf16 %v2903_v54 }
 0x182   : > { %v2918_v5 = vpop.permute.xlu1 %2917 }
 0x183   : > { %1190 = vst.msk [vmem:[#allocation2 + $0x70] sm:$0xff] %vm1175_vm8, %v2904_v26  ;;  %1191 = vst.msk [vmem:[#allocation2 + $0x78] sm:$0xff] %vm1175_vm8, %v2905_v22  ;;  %v2920_v43 = vunpack.i.h.bf16 %v2918_v5  ;;  %v2919_v27 = vunpack.i.l.bf16 %v2918_v5 }
 0x184   : > { %v2913_v45 = vpop.permute.xlu0 %2912 }
 0x185   : > { %1335 = vst.msk [vmem:[#allocation2 + $0xe0] sm:$0xff] %vm1306_vm9, %v2919_v27  ;;  %1336 = vst.msk [vmem:[#allocation2 + $0xe8] sm:$0xff] %vm1306_vm9, %v2920_v43  ;;  %v2915_v9 = vunpack.i.h.bf16 %v2913_v45  ;;  %v2914_v32 = vunpack.i.l.bf16 %v2913_v45 }
 0x186   : > { %v2928_v47 = vpop.permute.xlu1 %2927 }
 0x187   : > { %1319 = vst.msk [vmem:[#allocation2 + $0x60] sm:$0xff] %vm1306_vm9, %v2914_v32  ;;  %1320 = vst.msk [vmem:[#allocation2 + $0x68] sm:$0xff] %vm1306_vm9, %v2915_v9  ;;  %v2930_v62 = vunpack.i.h.bf16 %v2928_v47  ;;  %v2929_v23 = vunpack.i.l.bf16 %v2928_v47 }
 0x188   : > { %v2923_v59 = vpop.permute.xlu0 %2922 }
 0x189   : > { %1337 = vst.msk [vmem:[#allocation2 + $0xf0] sm:$0xff] %vm1306_vm9, %v2929_v23  ;;  %1338 = vst.msk [vmem:[#allocation2 + $0xf8] sm:$0xff] %vm1306_vm9, %v2930_v62  ;;  %v2925_v53 = vunpack.i.h.bf16 %v2923_v59  ;;  %v2924_v57 = vunpack.i.l.bf16 %v2923_v59 }
 0x18a   : > { %v2938_v36 = vpop.permute.xlu1 %2937 }
 0x18b   : > { %1321 = vst.msk [vmem:[#allocation2 + $0x70] sm:$0xff] %vm1306_vm9, %v2924_v57  ;;  %1322 = vst.msk [vmem:[#allocation2 + $0x78] sm:$0xff] %vm1306_vm9, %v2925_v53  ;;  %v2940_v11 = vunpack.i.h.bf16 %v2938_v36  ;;  %v2939_v2 = vunpack.i.l.bf16 %v2938_v36 }
 0x18c   : > { %v2933_v10 = vpop.permute.xlu0 %2932 }
 0x18d   : > { %1470 = vst.msk [vmem:[#allocation2 + $0xe0] sm:$0xff] %vm1441_vm10, %v2939_v2  ;;  %1471 = vst.msk [vmem:[#allocation2 + $0xe8] sm:$0xff] %vm1441_vm10, %v2940_v11  ;;  %v2935_v29 = vunpack.i.h.bf16 %v2933_v10  ;;  %v2934_v1 = vunpack.i.l.bf16 %v2933_v10 }
 0x18e   : > { %v2948_v48 = vpop.permute.xlu1 %2947 }
 0x18f   : > { %1454 = vst.msk [vmem:[#allocation2 + $0x60] sm:$0xff] %vm1441_vm10, %v2934_v1  ;;  %1455 = vst.msk [vmem:[#allocation2 + $0x68] sm:$0xff] %vm1441_vm10, %v2935_v29  ;;  %v2950_v51 = vunpack.i.h.bf16 %v2948_v48  ;;  %v2949_v15 = vunpack.i.l.bf16 %v2948_v48 }
 0x190   : > { %v2943_v16 = vpop.permute.xlu0 %2942 }
 0x191   : > { %1472 = vst.msk [vmem:[#allocation2 + $0xf0] sm:$0xff] %vm1441_vm10, %v2949_v15  ;;  %1473 = vst.msk [vmem:[#allocation2 + $0xf8] sm:$0xff] %vm1441_vm10, %v2950_v51  ;;  %v2945_v31 = vunpack.i.h.bf16 %v2943_v16  ;;  %v2944_v44 = vunpack.i.l.bf16 %v2943_v16 }
 0x192   : > { %v2958_v37 = vpop.permute.xlu1 %2957 }
 0x193   : > { %1456 = vst.msk [vmem:[#allocation2 + $0x70] sm:$0xff] %vm1441_vm10, %v2944_v44  ;;  %1457 = vst.msk [vmem:[#allocation2 + $0x78] sm:$0xff] %vm1441_vm10, %v2945_v31  ;;  %v2960_v50 = vunpack.i.h.bf16 %v2958_v37  ;;  %v2959_v60 = vunpack.i.l.bf16 %v2958_v37 }
 0x194   : > { %v2953_v12 = vpop.permute.xlu0 %2952 }
 0x195   : > { %1604 = vst.msk [vmem:[#allocation2 + $0xe0] sm:$0xff] %vm1575_vm11, %v2959_v60  ;;  %1605 = vst.msk [vmem:[#allocation2 + $0xe8] sm:$0xff] %vm1575_vm11, %v2960_v50  ;;  %v2955_v13 = vunpack.i.h.bf16 %v2953_v12  ;;  %v2954_v33 = vunpack.i.l.bf16 %v2953_v12 }
 0x196   : > { %v2968_v14 = vpop.permute.xlu1 %2967 }
 0x197   : > { %1588 = vst.msk [vmem:[#allocation2 + $0x60] sm:$0xff] %vm1575_vm11, %v2954_v33  ;;  %1589 = vst.msk [vmem:[#allocation2 + $0x68] sm:$0xff] %vm1575_vm11, %v2955_v13  ;;  %v2970_v20 = vunpack.i.h.bf16 %v2968_v14  ;;  %v2969_v56 = vunpack.i.l.bf16 %v2968_v14 }
 0x198   : > { %v2963_v18 = vpop.permute.xlu0 %2962 }
 0x199   : > { %1606 = vst.msk [vmem:[#allocation2 + $0xf0] sm:$0xff] %vm1575_vm11, %v2969_v56  ;;  %1607 = vst.msk [vmem:[#allocation2 + $0xf8] sm:$0xff] %vm1575_vm11, %v2970_v20  ;;  %v2965_v4 = vunpack.i.h.bf16 %v2963_v18  ;;  %v2964_v41 = vunpack.i.l.bf16 %v2963_v18 }
 0x19b   : > { %1590 = vst.msk [vmem:[#allocation2 + $0x70] sm:$0xff] %vm1575_vm11, %v2964_v41  ;;  %1591 = vst.msk [vmem:[#allocation2 + $0x78] sm:$0xff] %vm1575_vm11, %v2965_v4 }
 0x19c   : > { %v1636_v42 = vld [vmem:[#allocation2 + $0xe0] sm:$0xff]  ;;  %v1637_v3 = vld [vmem:[#allocation2 + $0xe8] sm:$0xff] }
 0x19d   : > { %v1654_v49 = vpack.c.bf16 %v1637_v3, %v1636_v42 }
 0x19e   : > { %v1620_v25 = vld [vmem:[#allocation2 + $0x60] sm:$0xff]  ;;  %v1621_v7 = vld [vmem:[#allocation2 + $0x68] sm:$0xff] }
 0x19f   : > { %v1646_v38 = vpack.c.bf16 %v1621_v7, %v1620_v25  ;;  %2254 = vmatprep.mubr.msk.bf16.mxu1 %vm1683_vm12, %v1654_v49 }
 0x1a0   : > { %v1638_v52 = vld [vmem:[#allocation2 + $0xf0] sm:$0xff]  ;;  %v1639_v63 = vld [vmem:[#allocation2 + $0xf8] sm:$0xff] }
 0x1a1   : > { %2238 = vmatprep.mubr.msk.bf16.mxu0 %vm1683_vm12, %v1646_v38  ;;  %v1655_v39 = vpack.c.bf16 %v1639_v63, %v1638_v52 }
 0x1a2   : > { %v1622_v6 = vld [vmem:[#allocation2 + $0x70] sm:$0xff]  ;;  %v1623_v55 = vld [vmem:[#allocation2 + $0x78] sm:$0xff] }
 0x1a3   : > { %v1647_v8 = vpack.c.bf16 %v1623_v55, %v1622_v6  ;;  %2255 = vmatmul.mubr.msk.bf16.gmra.mrb[12].mxu1 %vm1683_vm12, %v1655_v39 }
 0x1a5   : > { %2239 = vmatmul.mubr.msk.bf16.gmra.mrb[12].mxu0 %vm1683_vm12, %v1647_v8 }
 0x1fe   : > { %v2244_v58 = vpop.f32.mrb[0].mxu1 }
 0x1ff   : > { %v1843_v30 = vadd.f32 %v2244_v58, %v4227_v61  ;;  %v1834_v40 = vpop.f32.mrb[1].mxu1 }
 0x200   : > { %v2228_v35 = vpop.f32.mrb[0].mxu0  ;;  %v1835_v0 = vadd.f32 %v4227_v61, %v1834_v40  ;;  %v2245_v46 = vpop.f32.mrb[2].mxu1 }
 0x201   : > { %v1779_v19 = vadd.f32 %v2228_v35, %v4227_v61  ;;  %vm1915_vm13 = vcmp.gt.f32.partialorder %v1843_v30, 0.0  ;;  %v1947_v24 = vmul.f32 0.2, %v1843_v30  ;;  %v1770_v34 = vpop.f32.mrb[1].mxu0  ;;  %v1846_v21 = vadd.f32 %v2245_v46, %v4227_v61  ;;  %v1837_v17 = vpop.f32.mrb[3].mxu1 }
 0x202   : > { %v1771_v28 = vadd.f32 %v4227_v61, %v1770_v34  ;;  %vm1913_vm14 = vcmp.gt.f32.partialorder %v1835_v0, 0.0  ;;  %v1945_v54 = vmul.f32 0.2, %v1835_v0  ;;  %v2229_v22 = vpop.f32.mrb[2].mxu0  ;;  %v1838_v26 = vadd.f32 %v4227_v61, %v1837_v17 }
 0x203   : > { %vm1899_vm15 = vcmp.gt.f32.partialorder %v1779_v19, 0.0  ;;  %v1931_v5 = vmul.f32 0.2, %v1779_v19  ;;  %v1979_v43 = vsel %vm1915_vm13, %v1843_v30, %v1947_v24  ;;  %v1782_v27 = vadd.f32 %v2229_v22, %v4227_v61  ;;  %v1773_v45 = vpop.f32.mrb[3].mxu0 }
 0x204   : > { %2011 = vst [vmem:[%s4238_s6 + $0x90] sm:$0xff] %v1979_v43  ;;  %vm1897_vm0 = vcmp.gt.f32.partialorder %v1771_v28, 0.0  ;;  %v1929_v9 = vmul.f32 0.2, %v1771_v28  ;;  %v1977_v32 = vsel %vm1913_vm14, %v1835_v0, %v1945_v54  ;;  %vm1916_vm1 = vcmp.gt.f32.partialorder %v1846_v21, 0.0 }
 0x205   : > { %v1963_v47 = vsel %vm1899_vm15, %v1779_v19, %v1931_v5  ;;  %2009 = vst [vmem:[%s4238_s6 + $0x80] sm:$0xff] %v1977_v32  ;;  %vm1900_vm2 = vcmp.gt.f32.partialorder %v1782_v27, 0.0  ;;  %v1932_v62 = vmul.f32 0.2, %v1782_v27  ;;  %v1948_v23 = vmul.f32 0.2, %v1846_v21 }
 0x206   : > { %1995 = vst [vmem:[%s4238_s6 + $0x10] sm:$0xff] %v1963_v47  ;;  %v1961_v59 = vsel %vm1897_vm0, %v1771_v28, %v1929_v9  ;;  %v1774_v53 = vadd.f32 %v4227_v61, %v1773_v45  ;;  %vm1914_vm3 = vcmp.gt.f32.partialorder %v1838_v26, 0.0  ;;  %v1946_v57 = vmul.f32 0.2, %v1838_v26 }
 0x207   : > { %1993 = vst [vmem:[%s4238_s6] sm:$0xff] %v1961_v59  ;;  %v1964_v36 = vsel %vm1900_vm2, %v1782_v27, %v1932_v62  ;;  %v1980_v11 = vsel %vm1916_vm1, %v1846_v21, %v1948_v23 }
 0x208   : > { %1996 = vst [vmem:[%s4238_s6 + $0x18] sm:$0xff] %v1964_v36  ;;  %2012 = vst [vmem:[%s4238_s6 + $0x98] sm:$0xff] %v1980_v11  ;;  %vm1898_vm4 = vcmp.gt.f32.partialorder %v1774_v53, 0.0  ;;  %v1930_v2 = vmul.f32 0.2, %v1774_v53  ;;  %v1978_v10 = vsel %vm1914_vm3, %v1838_v26, %v1946_v57 }
 0x209   : > { %2010 = vst [vmem:[%s4238_s6 + $0x88] sm:$0xff] %v1978_v10 }
 0x20a   : > { %v1962_v29 = vsel %vm1898_vm4, %v1774_v53, %v1930_v2 }
 0x20b   : > { %1994 = vst [vmem:[%s4238_s6 + $0x8] sm:$0xff] %v1962_v29 }
 0x226   : > { %v2248_v1 = vpop.f32.mrb[4].mxu1 }
 0x227   : > { %v1859_v48 = vadd.f32 %v2248_v1, %v4227_v61  ;;  %v1850_v51 = vpop.f32.mrb[5].mxu1 }
 0x228   : > { %v2232_v15 = vpop.f32.mrb[4].mxu0  ;;  %v1851_v16 = vadd.f32 %v4227_v61, %v1850_v51  ;;  %v2249_v31 = vpop.f32.mrb[6].mxu1 }
 0x229   : > { %v1795_v44 = vadd.f32 %v2232_v15, %v4227_v61  ;;  %vm1919_vm5 = vcmp.gt.f32.partialorder %v1859_v48, 0.0  ;;  %v1951_v37 = vmul.f32 0.2, %v1859_v48  ;;  %v1786_v50 = vpop.f32.mrb[5].mxu0  ;;  %v1862_v60 = vadd.f32 %v2249_v31, %v4227_v61  ;;  %v1853_v12 = vpop.f32.mrb[7].mxu1 }
 0x22a   : > { %v1787_v13 = vadd.f32 %v4227_v61, %v1786_v50  ;;  %vm1917_vm6 = vcmp.gt.f32.partialorder %v1851_v16, 0.0  ;;  %v1949_v33 = vmul.f32 0.2, %v1851_v16  ;;  %v2233_v14 = vpop.f32.mrb[6].mxu0  ;;  %v1854_v20 = vadd.f32 %v4227_v61, %v1853_v12 }
 0x22b   : > { %vm1903_vm7 = vcmp.gt.f32.partialorder %v1795_v44, 0.0  ;;  %v1935_v56 = vmul.f32 0.2, %v1795_v44  ;;  %v1983_v18 = vsel %vm1919_vm5, %v1859_v48, %v1951_v37  ;;  %v1798_v4 = vadd.f32 %v2233_v14, %v4227_v61  ;;  %v1789_v41 = vpop.f32.mrb[7].mxu0 }
 0x22c   : > { %2015 = vst [vmem:[%s4238_s6 + $0xb0] sm:$0xff] %v1983_v18  ;;  %vm1901_vm8 = vcmp.gt.f32.partialorder %v1787_v13, 0.0  ;;  %v1933_v42 = vmul.f32 0.2, %v1787_v13  ;;  %v1981_v3 = vsel %vm1917_vm6, %v1851_v16, %v1949_v33  ;;  %vm1920_vm9 = vcmp.gt.f32.partialorder %v1862_v60, 0.0 }
 0x22d   : > { %v1967_v49 = vsel %vm1903_vm7, %v1795_v44, %v1935_v56  ;;  %2013 = vst [vmem:[%s4238_s6 + $0xa0] sm:$0xff] %v1981_v3  ;;  %vm1904_vm10 = vcmp.gt.f32.partialorder %v1798_v4, 0.0  ;;  %v1936_v25 = vmul.f32 0.2, %v1798_v4  ;;  %v1952_v7 = vmul.f32 0.2, %v1862_v60 }
 0x22e   : > { %1999 = vst [vmem:[%s4238_s6 + $0x30] sm:$0xff] %v1967_v49  ;;  %v1965_v38 = vsel %vm1901_vm8, %v1787_v13, %v1933_v42  ;;  %v1790_v52 = vadd.f32 %v4227_v61, %v1789_v41  ;;  %vm1918_vm11 = vcmp.gt.f32.partialorder %v1854_v20, 0.0  ;;  %v1950_v63 = vmul.f32 0.2, %v1854_v20 }
 0x22f   : > { %1997 = vst [vmem:[%s4238_s6 + $0x20] sm:$0xff] %v1965_v38  ;;  %v1968_v39 = vsel %vm1904_vm10, %v1798_v4, %v1936_v25  ;;  %v1984_v6 = vsel %vm1920_vm9, %v1862_v60, %v1952_v7 }
 0x230   : > { %2000 = vst [vmem:[%s4238_s6 + $0x38] sm:$0xff] %v1968_v39  ;;  %2016 = vst [vmem:[%s4238_s6 + $0xb8] sm:$0xff] %v1984_v6  ;;  %vm1902_vm12 = vcmp.gt.f32.partialorder %v1790_v52, 0.0  ;;  %v1934_v55 = vmul.f32 0.2, %v1790_v52  ;;  %v1982_v8 = vsel %vm1918_vm11, %v1854_v20, %v1950_v63 }
 0x231   : > { %2014 = vst [vmem:[%s4238_s6 + $0xa8] sm:$0xff] %v1982_v8 }
 0x232   : > { %v1966_v58 = vsel %vm1902_vm12, %v1790_v52, %v1934_v55 }
 0x233   : > { %1998 = vst [vmem:[%s4238_s6 + $0x28] sm:$0xff] %v1966_v58 }
 0x24e   : > { %v2252_v30 = vpop.f32.mrb[8].mxu1 }
 0x24f   : > { %v1875_v40 = vadd.f32 %v2252_v30, %v4227_v61  ;;  %v1866_v35 = vpop.f32.mrb[9].mxu1 }
 0x250   : > { %v2236_v0 = vpop.f32.mrb[8].mxu0  ;;  %v1867_v46 = vadd.f32 %v4227_v61, %v1866_v35  ;;  %v2253_v19 = vpop.f32.mrb[10].mxu1 }
 0x251   : > { %v1811_v24 = vadd.f32 %v2236_v0, %v4227_v61  ;;  %vm1923_vm13 = vcmp.gt.f32.partialorder %v1875_v40, 0.0  ;;  %v1955_v34 = vmul.f32 0.2, %v1875_v40  ;;  %v1802_v21 = vpop.f32.mrb[9].mxu0  ;;  %v1878_v17 = vadd.f32 %v2253_v19, %v4227_v61  ;;  %v1869_v28 = vpop.f32.mrb[11].mxu1 }
 0x252   : > { %v1803_v54 = vadd.f32 %v4227_v61, %v1802_v21  ;;  %vm1921_vm14 = vcmp.gt.f32.partialorder %v1867_v46, 0.0  ;;  %v1953_v22 = vmul.f32 0.2, %v1867_v46  ;;  %v2237_v26 = vpop.f32.mrb[10].mxu0  ;;  %v1870_v5 = vadd.f32 %v4227_v61, %v1869_v28 }
 0x253   : > { %vm1907_vm15 = vcmp.gt.f32.partialorder %v1811_v24, 0.0  ;;  %v1939_v43 = vmul.f32 0.2, %v1811_v24  ;;  %v1987_v27 = vsel %vm1923_vm13, %v1875_v40, %v1955_v34  ;;  %v1814_v45 = vadd.f32 %v2237_v26, %v4227_v61  ;;  %v1805_v9 = vpop.f32.mrb[11].mxu0 }
 0x254   : > { %2019 = vst [vmem:[%s4238_s6 + $0xd0] sm:$0xff] %v1987_v27  ;;  %vm1905_vm0 = vcmp.gt.f32.partialorder %v1803_v54, 0.0  ;;  %v1937_v32 = vmul.f32 0.2, %v1803_v54  ;;  %v1985_v47 = vsel %vm1921_vm14, %v1867_v46, %v1953_v22  ;;  %vm1924_vm1 = vcmp.gt.f32.partialorder %v1878_v17, 0.0 }
 0x255   : > { %v1971_v62 = vsel %vm1907_vm15, %v1811_v24, %v1939_v43  ;;  %2017 = vst [vmem:[%s4238_s6 + $0xc0] sm:$0xff] %v1985_v47  ;;  %vm1908_vm2 = vcmp.gt.f32.partialorder %v1814_v45, 0.0  ;;  %v1940_v23 = vmul.f32 0.2, %v1814_v45  ;;  %v1956_v59 = vmul.f32 0.2, %v1878_v17 }
 0x256   : > { %2003 = vst [vmem:[%s4238_s6 + $0x50] sm:$0xff] %v1971_v62  ;;  %v1969_v53 = vsel %vm1905_vm0, %v1803_v54, %v1937_v32  ;;  %v1806_v57 = vadd.f32 %v4227_v61, %v1805_v9  ;;  %vm1922_vm3 = vcmp.gt.f32.partialorder %v1870_v5, 0.0  ;;  %v1954_v36 = vmul.f32 0.2, %v1870_v5 }
 0x257   : > { %2001 = vst [vmem:[%s4238_s6 + $0x40] sm:$0xff] %v1969_v53  ;;  %v1972_v11 = vsel %vm1908_vm2, %v1814_v45, %v1940_v23  ;;  %v1988_v2 = vsel %vm1924_vm1, %v1878_v17, %v1956_v59 }
 0x258   : > { %2004 = vst [vmem:[%s4238_s6 + $0x58] sm:$0xff] %v1972_v11  ;;  %2020 = vst [vmem:[%s4238_s6 + $0xd8] sm:$0xff] %v1988_v2  ;;  %vm1906_vm4 = vcmp.gt.f32.partialorder %v1806_v57, 0.0  ;;  %v1938_v10 = vmul.f32 0.2, %v1806_v57  ;;  %v1986_v29 = vsel %vm1922_vm3, %v1870_v5, %v1954_v36 }
 0x259   : > { %2018 = vst [vmem:[%s4238_s6 + $0xc8] sm:$0xff] %v1986_v29 }
 0x25a   : > { %v1970_v1 = vsel %vm1906_vm4, %v1806_v57, %v1938_v10 }
 0x25b   : > { %2002 = vst [vmem:[%s4238_s6 + $0x48] sm:$0xff] %v1970_v1 }
 0x276   : > { %v2256_v48 = vpop.f32.mrb[12].mxu1 }
 0x277   : > { %v1891_v51 = vadd.f32 %v2256_v48, %v4227_v61  ;;  %v1882_v15 = vpop.f32.mrb[13].mxu1 }
 0x278   : > { %v2240_v16 = vpop.f32.mrb[12].mxu0  ;;  %v1883_v31 = vadd.f32 %v4227_v61, %v1882_v15  ;;  %v2257_v44 = vpop.f32.mrb[14].mxu1 }
 0x279   : > { %v1827_v37 = vadd.f32 %v2240_v16, %v4227_v61  ;;  %vm1927_vm5 = vcmp.gt.f32.partialorder %v1891_v51, 0.0  ;;  %v1959_v50 = vmul.f32 0.2, %v1891_v51  ;;  %v1818_v60 = vpop.f32.mrb[13].mxu0  ;;  %v1894_v12 = vadd.f32 %v2257_v44, %v4227_v61  ;;  %v1885_v13 = vpop.f32.mrb[15].mxu1 }
 0x27a   : > { %v1819_v33 = vadd.f32 %v4227_v61, %v1818_v60  ;;  %vm1925_vm6 = vcmp.gt.f32.partialorder %v1883_v31, 0.0  ;;  %v1957_v14 = vmul.f32 0.2, %v1883_v31  ;;  %v2241_v20 = vpop.f32.mrb[14].mxu0  ;;  %v1886_v56 = vadd.f32 %v4227_v61, %v1885_v13 }
 0x27b   : > { %vm1911_vm7 = vcmp.gt.f32.partialorder %v1827_v37, 0.0  ;;  %v1943_v18 = vmul.f32 0.2, %v1827_v37  ;;  %v1991_v4 = vsel %vm1927_vm5, %v1891_v51, %v1959_v50  ;;  %v1830_v41 = vadd.f32 %v2241_v20, %v4227_v61  ;;  %v1821_v42 = vpop.f32.mrb[15].mxu0 }
 0x27c   : > { %2023 = vst [vmem:[%s4238_s6 + $0xf0] sm:$0xff] %v1991_v4  ;;  %vm1909_vm8 = vcmp.gt.f32.partialorder %v1819_v33, 0.0  ;;  %v1941_v3 = vmul.f32 0.2, %v1819_v33  ;;  %v1989_v49 = vsel %vm1925_vm6, %v1883_v31, %v1957_v14  ;;  %vm1928_vm9 = vcmp.gt.f32.partialorder %v1894_v12, 0.0 }
 0x27d   : > { %v1975_v25 = vsel %vm1911_vm7, %v1827_v37, %v1943_v18  ;;  %2021 = vst [vmem:[%s4238_s6 + $0xe0] sm:$0xff] %v1989_v49  ;;  %vm1912_vm10 = vcmp.gt.f32.partialorder %v1830_v41, 0.0  ;;  %v1944_v7 = vmul.f32 0.2, %v1830_v41  ;;  %v1960_v38 = vmul.f32 0.2, %v1894_v12 }
 0x27e   : > { %2007 = vst [vmem:[%s4238_s6 + $0x70] sm:$0xff] %v1975_v25  ;;  %v1973_v52 = vsel %vm1909_vm8, %v1819_v33, %v1941_v3  ;;  %v1822_v63 = vadd.f32 %v4227_v61, %v1821_v42  ;;  %vm1926_vm11 = vcmp.gt.f32.partialorder %v1886_v56, 0.0  ;;  %v1958_v39 = vmul.f32 0.2, %v1886_v56 }
 0x27f   : > { %2005 = vst [vmem:[%s4238_s6 + $0x60] sm:$0xff] %v1973_v52  ;;  %v1976_v6 = vsel %vm1912_vm10, %v1830_v41, %v1944_v7  ;;  %v1992_v55 = vsel %vm1928_vm9, %v1894_v12, %v1960_v38 }
 0x280   : > { %2008 = vst [vmem:[%s4238_s6 + $0x78] sm:$0xff] %v1976_v6  ;;  %2024 = vst [vmem:[%s4238_s6 + $0xf8] sm:$0xff] %v1992_v55  ;;  %vm1910_vm12 = vcmp.gt.f32.partialorder %v1822_v63, 0.0  ;;  %v1942_v8 = vmul.f32 0.2, %v1822_v63  ;;  %v1990_v58 = vsel %vm1926_vm11, %v1886_v56, %v1958_v39 }
 0x281   : > { %2022 = vst [vmem:[%s4238_s6 + $0xe8] sm:$0xff] %v1990_v58 }
 0x282   : > { %v1974_v61 = vsel %vm1910_vm12, %v1822_v63, %v1942_v8 }
 0x283   : > { %2006 = vst [vmem:[%s4238_s6 + $0x68] sm:$0xff] %v1974_v61 }
 0x284   : > { %2987 = shalt.err (!%p2984_p5)
}
 0x285   : > { %s2988_s26 = scalar_lea.hbm %s4300_s10, 4096  ;;  %s2992_s29 = scalar_lea.hbm %s4358_s3, 8192 }
 0x286   : > { %p2989_p6 = scmp.ne.s32.totalorder %s4300_s10, %s2988_s26  ;;  %p2993_p10 = scmp.lt.u32.totalorder %s4300_s10, %s4358_s3 }
 0x287   : > { %p2994_p11 = scmp.lt.u32.totalorder %s2992_s29, %s2988_s26  ;;  %p2996_p13 = scmp.lt.u32.totalorder %s2988_s26, %s4300_s10 }
 0x288   : > { %p2990_p7 = pnand %p2989_p6, %p3124_p4 }
 0x289   : > { %p2995_p12 = por %p2994_p11, %p2993_p10 }
 0x28a   : > { %p2991_p9 = pneg %p2990_p7 }
 0x28b   : > { %p2997_p0 = por %p2996_p13, %p2995_p12 }
 0x28d   : > { %p2998_p1 = pnand %p2997_p0, %p2991_p9 }
 0x28f   : > { %3001 = shalt.err (!%p2998_p1)
}
 0x290   : > { %s3063_s6 = smov 128  }
 0x291   : > { %2267 = dma.vmem_to_hbm [thread:$0]  (%p3124_p4), %s4303_s8, 4096, %s4300_s10, %s4308_s11, %s3063_s6, %s3063_s6, %s3055_s5  }
 0x292 PF: > { %p2273_p2 = scmp.ge.s32.totalorder %s3052_s17, 2  ;;  %s2057_s7 = sand.u32 1, %s3032_s12  }
 0x293   : > { %s2058_s15 = scalar_lea.sflag [#allocation4], %s2057_s7 }
 0x294   : > { %p2270_p3 = pnand %p2273_p2, %p3131_p8 }
 0x296   : > { %3027 = dma.done.wait (!%p2270_p3), %s2058_s15, 4096  }
 0x297   : > { %3029 = vsyncadd (!%p2270_p3), %s2058_s15, 4294963200  ;;  %s16_s17 = sadd.s32 1, %s3052_s17   ;;  %s4450_s12 = smov %s3036_s13 }
 0x298   : > { %p13_p5 = scmp.ge.s32.totalorder %s16_s17, 4   ;;  %s4451_s13 = smov %s3040_s14 }
 0x299   : > { %s4452_s14 = smov %s3137_s25  ;;  %s4453_s15 = smov %s3048_s16 }
 0x29a   : > { %s4454_s16 = smov %s4456_s20  ;;  %15 = sbr.rel (!%p13_p5) target bundleno = 4 (0x4), region = 67 }
 0x2a1   :  { %2063 = vsyncpa [#allocation4], 1 }
 0x2a2   :  { %2065 = vsyncpa [#allocation4 + $0x1], 1 }

</bundles_post_ra>
